<compile_context>
chip_gen: v6e
topology: v6e:2x2x1
jax: 0.10.0
libtpu: 0.0.40
codegen_flags: <defaults>
</compile_context>

<pallas_src>
import jax
import jax.numpy as jnp
from jax.experimental import pallas as pl
from jax.experimental.pallas import tpu as pltpu

# ----------------------------- configuration --------------------------------
REG_MAX = 4
B4 = 4 * REG_MAX            # 16 box-regression (DFL) channels
NUM_CLASSES = 8             # number of text prompts / classes
TXT_DIM = 32                # text / visual embedding dim (512 in real model)
STRIDES = (8, 16, 32)
COUT = B4 + NUM_CLASSES     # 24 output channels (unpadded, lane-masked stores)


# ------------------------------ Pallas kernel --------------------------------
def _head_kernel(patch_ref, w1_ref, b1_ref, w2_ref, b2_ref, out_ref):
    # patch_ref: (1, TP, K)     bf16  im2col patches (one image, one row tile)
    # w1_ref:    (K, D)         bf16  strided-conv stem weights (shared)
    # b1_ref:    (1, D)         f32   stem bias
    # w2_ref:    (1, D, COUT)   bf16  fused per-image [box | cls] weights
    # b2_ref:    (1, COUT)      f32   fused [box-bias | 0] bias
    # out_ref:   (1, TP, COUT)  f32   unpadded output tile
    feat = jnp.dot(patch_ref[0], w1_ref[...],
                   preferred_element_type=jnp.float32)            # (TP, D)
    feat = jnp.maximum(feat + b1_ref[...], 0.0)                   # ReLU, f32
    out = jnp.dot(feat.astype(jnp.bfloat16), w2_ref[0],
                  preferred_element_type=jnp.float32)             # (TP, COUT)
    out_ref[0] = out + b2_ref[...]


def _round_up(x, m):
    return ((x + m - 1) // m) * m


def _pick_tile(P, N, max_tile=1024):
    """Row-tile size.

    Full level if it fits in one tile (block == full dim is always legal),
    otherwise a multiple of 8 <= max_tile.  With N == 1, force >= 2 row tiles
    so both v7x TensorCores get work under ("parallel", "parallel") semantics.
    """
    if P <= max_tile and not (N == 1 and P > 8):
        return P
    tp = min(max_tile, _round_up(P, 8))
    if N == 1:
        tp = min(tp, max(8, _round_up((P + 1) // 2, 8)))
    return tp


def _run_level(patches, w1, b1, w2, b2):
    N, P, K = patches.shape
    D = w1.shape[1]
    TP = _pick_tile(P, N)
    n_row_tiles = pl.cdiv(P, TP)
    P_pad = n_row_tiles * TP
    if P_pad != P:
        # Robust tail handling: pad a few rows instead of a whole-level tile.
        patches = jnp.pad(patches, ((0, 0), (0, P_pad - P), (0, 0)))

    out = pl.pallas_call(
        _head_kernel,
        out_shape=jax.ShapeDtypeStruct((N, P_pad, COUT), jnp.float32),
        grid=(N, n_row_tiles),
        in_specs=[
            pl.BlockSpec((1, TP, K), lambda n, t: (n, t, 0)),      # patches
            pl.BlockSpec((K, D), lambda n, t: (0, 0)),             # w1 (shared)
            pl.BlockSpec((1, D), lambda n, t: (0, 0)),             # b1
            pl.BlockSpec((1, D, COUT), lambda n, t: (n, 0, 0)),    # fused w2
            pl.BlockSpec((1, COUT), lambda n, t: (0, 0)),          # fused b2
        ],
        out_specs=pl.BlockSpec((1, TP, COUT), lambda n, t: (n, t, 0)),
        compiler_params=pltpu.CompilerParams(
            dimension_semantics=("parallel", "parallel"),
            vmem_limit_bytes=32 * 1024 * 1024,
        ),
    )(patches, w1, b1, w2, b2)

    if P_pad != P:
        out = out[:, :P]
    return out


# ------------------------------- JAX glue ------------------------------------
def _im2col_nchw(x_nchw, s):
    """NCHW input -> non-overlapping s x s patches, fused permute + im2col.

    Returns (N, Hs*Ws, s*s*C) with per-patch feature order (dy, dx, channel).
    """
    N, C, H, W = x_nchw.shape
    Hs, Ws = H // s, W // s
    x = x_nchw.reshape(N, C, Hs, s, Ws, s)
    x = jnp.transpose(x, (0, 2, 4, 3, 5, 1))          # (N, Hs, Ws, s, s, C)
    return x.reshape(N, Hs * Ws, s * s * C), Hs, Ws


def init_params(key):
    params = []
    for s in STRIDES:
        key, k1, k2 = jax.random.split(key, 3)
        K = s * s * 3
        w1 = jax.random.normal(k1, (K, TXT_DIM), jnp.float32) / jnp.sqrt(float(K))
        b1 = jnp.zeros((1, TXT_DIM), jnp.float32)
        wbox = (jax.random.normal(k2, (TXT_DIM, B4), jnp.float32)
                / jnp.sqrt(float(TXT_DIM)))
        bbox = jnp.zeros((1, B4), jnp.float32)
        params.append((w1, b1, wbox, bbox))
    return params


@jax.jit
def model_exporter_forward(x_nchw, txt_feats, params):
    """Mirrors ModelExporter.forward: returns [stride8, stride16, stride32],
    each already permuted to NHWC (the reference permutes NCHW -> NHWC)."""
    N, C, H, W = x_nchw.shape
    assert H % max(STRIDES) == 0 and W % max(STRIDES) == 0, \
        "input spatial dims must be divisible by 32"
    x = x_nchw.astype(jnp.bfloat16)                    # single bf16 cast, pre-im2col
    txt = txt_feats.astype(jnp.float32)
    NC = txt.shape[1]
    txt_t = jnp.transpose(txt, (0, 2, 1)).astype(jnp.bfloat16)   # (N, D, NC), hoisted

    outputs = []
    for s, (w1, b1, wbox, bbox) in zip(STRIDES, params):
        patches, Hs, Ws = _im2col_nchw(x, s)           # bf16, (N, P, K)
        # Fused per-image [box | cls] weights (no lane padding).
        w2 = jnp.concatenate(
            [jnp.broadcast_to(wbox.astype(jnp.bfloat16)[None], (N,) + wbox.shape),
             txt_t],
            axis=2)                                    # (N, D, COUT) bf16
        b2 = jnp.pad(bbox, ((0, 0), (0, NC)))          # (1, COUT), cls bias = 0
        out = _run_level(patches, w1.astype(jnp.bfloat16), b1, w2, b2)
        outputs.append(out.reshape(N, Hs, Ws, B4 + NC))   # free contiguous reshape
    return outputs


def _reference_forward(x_nchw, txt_feats, params):
    """Pure-JAX reference (same bf16 casts, f32 accumulation)."""
    x = x_nchw.astype(jnp.bfloat16)
    txt = txt_feats.astype(jnp.float32)
    N, NC = txt.shape[0], txt.shape[1]
    outs = []
    for s, (w1, b1, wbox, bbox) in zip(STRIDES, params):
        patches, Hs, Ws = _im2col_nchw(x, s)
        feat = jnp.einsum('npk,kd->npd', patches, w1.astype(jnp.bfloat16),
                          preferred_element_type=jnp.float32) + b1[None]
        feat = jnp.maximum(feat, 0.0).astype(jnp.bfloat16)
        box = jnp.einsum('npd,db->npb', feat, wbox.astype(jnp.bfloat16),
                         preferred_element_type=jnp.float32) + bbox[None]
        cls = jnp.einsum('npd,ncd->npc', feat, txt.astype(jnp.bfloat16),
                         preferred_element_type=jnp.float32)
        outs.append(jnp.concatenate([box, cls], axis=-1)
                    .reshape(N, Hs, Ws, B4 + NC))
    return outs


# --------------------------------- main ---------------------------------------
if __name__ == "__main__":
    key = jax.random.PRNGKey(0)
    key, kx, kt, kp = jax.random.split(key, 4)

    N, H, W = 2, 32, 32
    x = jax.random.normal(kx, (N, 3, H, W), jnp.float32)       # NCHW (torch conv input)
    txt_feats = jax.random.normal(kt, (N, NUM_CLASSES, TXT_DIM), jnp.float32)

    params = init_params(kp)

    outs = model_exporter_forward(x, txt_feats, params)
    outs = [jax.block_until_ready(o) for o in outs]

    # sanity: shapes are NHWC (H/s, W/s, 4*reg_max + num_classes) per stride
    expected = [(N, H // s, W // s, COUT) for s in STRIDES]
    assert [tuple(o.shape) for o in outs] == expected, \
        f"shape mismatch: {[o.shape for o in outs]} vs {expected}"

    # correctness vs pure-JAX reference (same bf16 inputs, f32 accumulation)
    refs = _reference_forward(x, txt_feats, params)
    for o, r in zip(outs, refs):
        assert jnp.allclose(o, r, atol=1e-2, rtol=1e-2), "numerical mismatch"

    print("KERNEL_OK")
</pallas_src>

<mosaic_0001>
module attributes {stable_mosaic.version = 11 : i64} {
  func.func @_head_kernel(%arg0: i32, %arg1: i32, %arg2: memref<1x16x192xbf16, #tpu.memory_space<vmem>>, %arg3: memref<192x32xbf16, #tpu.memory_space<vmem>>, %arg4: memref<1x32xf32, #tpu.memory_space<vmem>>, %arg5: memref<1x32x24xbf16, #tpu.memory_space<vmem>>, %arg6: memref<1x24xf32, #tpu.memory_space<vmem>>, %arg7: memref<1x16x24xf32, #tpu.memory_space<vmem>>) attributes {dimension_semantics = [#tpu.dimension_semantics<parallel>, #tpu.dimension_semantics<parallel>], iteration_bounds = array<i64: 2, 1>, scalar_prefetch = 0 : i64, scratch_operands = 0 : i64, tpu.core_type = #tpu.core_type<tc>, window_params = [{transform_indices = @transform_0, window_bounds = array<i64: 1, 16, 192>}, {pipeline_mode = #tpu.pipeline_mode<synchronous>, transform_indices = @transform_1, window_bounds = array<i64: 192, 32>}, {pipeline_mode = #tpu.pipeline_mode<synchronous>, transform_indices = @transform_2, window_bounds = array<i64: 1, 32>}, {transform_indices = @transform_3, window_bounds = array<i64: 1, 32, 24>}, {pipeline_mode = #tpu.pipeline_mode<synchronous>, transform_indices = @transform_4, window_bounds = array<i64: 1, 24>}, {transform_indices = @transform_5, window_bounds = array<i64: 1, 16, 24>}]} {
    %c0 = arith.constant 0 : index
    %c0_0 = arith.constant 0 : index
    %c0_1 = arith.constant 0 : index
    %0 = vector.load %arg2[%c0, %c0_0, %c0_1] : memref<1x16x192xbf16, #tpu.memory_space<vmem>>, vector<1x16x192xbf16>
    %1 = vector.shape_cast %0 : vector<1x16x192xbf16> to vector<16x192xbf16>
    %c0_2 = arith.constant 0 : index
    %c0_3 = arith.constant 0 : index
    %2 = vector.load %arg3[%c0_2, %c0_3] : memref<192x32xbf16, #tpu.memory_space<vmem>>, vector<192x32xbf16>
    %cst = arith.constant dense<0.000000e+00> : vector<16x32xf32>
    %3 = tpu.matmul %1, %2, %cst {dimension_numbers = #tpu.dot_dimension_numbers<[1], [0], [0], [1], [0, 0, 1, 1], [], []>} : vector<16x192xbf16>, vector<192x32xbf16>, vector<16x32xf32> -> vector<16x32xf32>
    %c0_4 = arith.constant 0 : index
    %c0_5 = arith.constant 0 : index
    %4 = vector.load %arg4[%c0_4, %c0_5] : memref<1x32xf32, #tpu.memory_space<vmem>>, vector<1x32xf32>
    %5 = vector.broadcast %4 : vector<1x32xf32> to vector<16x32xf32>
    %6 = arith.addf %3, %5 : vector<16x32xf32>
    %cst_6 = arith.constant 0.000000e+00 : f32
    %7 = vector.broadcast %cst_6 : f32 to vector<16x32xf32>
    %8 = arith.maximumf %6, %7 : vector<16x32xf32>
    %9 = arith.truncf %8 : vector<16x32xf32> to vector<16x32xbf16>
    %c0_7 = arith.constant 0 : index
    %c0_8 = arith.constant 0 : index
    %c0_9 = arith.constant 0 : index
    %10 = vector.load %arg5[%c0_7, %c0_8, %c0_9] : memref<1x32x24xbf16, #tpu.memory_space<vmem>>, vector<1x32x24xbf16>
    %11 = vector.shape_cast %10 : vector<1x32x24xbf16> to vector<32x24xbf16>
    %cst_10 = arith.constant dense<0.000000e+00> : vector<16x24xf32>
    %12 = tpu.matmul %9, %11, %cst_10 {dimension_numbers = #tpu.dot_dimension_numbers<[1], [0], [0], [1], [0, 0, 1, 1], [], []>} : vector<16x32xbf16>, vector<32x24xbf16>, vector<16x24xf32> -> vector<16x24xf32>
    %c0_11 = arith.constant 0 : index
    %c0_12 = arith.constant 0 : index
    %13 = vector.load %arg6[%c0_11, %c0_12] : memref<1x24xf32, #tpu.memory_space<vmem>>, vector<1x24xf32>
    %14 = vector.broadcast %13 : vector<1x24xf32> to vector<16x24xf32>
    %15 = arith.addf %12, %14 : vector<16x24xf32>
    %c0_13 = arith.constant 0 : index
    %c0_14 = arith.constant 0 : index
    %c0_15 = arith.constant 0 : index
    %16 = vector.load %arg7[%c0_13, %c0_14, %c0_15] : memref<1x16x24xf32, #tpu.memory_space<vmem>>, vector<1x16x24xf32>
    %17 = vector.shape_cast %16 : vector<1x16x24xf32> to vector<16x24xf32>
    %18 = vector.shape_cast %15 : vector<16x24xf32> to vector<1x16x24xf32>
    tpu.vector_store %arg7[%c0_13, %c0_14, %c0_15], %18 {strides = array<i32>} : memref<1x16x24xf32, #tpu.memory_space<vmem>>, vector<1x16x24xf32>,
    return
  }
  func.func @transform_0(%arg0: i32, %arg1: i32) -> (i32, i32, i32) {
    %c0_i32 = arith.constant 0 : i32
    %c0_i32_0 = arith.constant 0 : i32
    return %arg0, %arg1, %c0_i32 : i32, i32, i32
  }
  func.func @transform_1(%arg0: i32, %arg1: i32) -> (i32, i32) {
    %c0_i32 = arith.constant 0 : i32
    %c0_i32_0 = arith.constant 0 : i32
    %c0_i32_1 = arith.constant 0 : i32
    return %c0_i32, %c0_i32_0 : i32, i32
  }
  func.func @transform_2(%arg0: i32, %arg1: i32) -> (i32, i32) {
    %c0_i32 = arith.constant 0 : i32
    %c0_i32_0 = arith.constant 0 : i32
    %c0_i32_1 = arith.constant 0 : i32
    return %c0_i32, %c0_i32_0 : i32, i32
  }
  func.func @transform_3(%arg0: i32, %arg1: i32) -> (i32, i32, i32) {
    %c0_i32 = arith.constant 0 : i32
    %c0_i32_0 = arith.constant 0 : i32
    %c0_i32_1 = arith.constant 0 : i32
    return %arg0, %c0_i32, %c0_i32_0 : i32, i32, i32
  }
  func.func @transform_4(%arg0: i32, %arg1: i32) -> (i32, i32) {
    %c0_i32 = arith.constant 0 : i32
    %c0_i32_0 = arith.constant 0 : i32
    %c0_i32_1 = arith.constant 0 : i32
    return %c0_i32, %c0_i32_0 : i32, i32
  }
  func.func @transform_5(%arg0: i32, %arg1: i32) -> (i32, i32, i32) {
    %c0_i32 = arith.constant 0 : i32
    %c0_i32_0 = arith.constant 0 : i32
    return %arg0, %arg1, %c0_i32 : i32, i32, i32
  }
}

module attributes {stable_mosaic.version = 11 : i64} {
  func.func @_head_kernel(%arg0: i32, %arg1: i32, %arg2: memref<1x4x768xbf16, #tpu.memory_space<vmem>>, %arg3: memref<768x32xbf16, #tpu.memory_space<vmem>>, %arg4: memref<1x32xf32, #tpu.memory_space<vmem>>, %arg5: memref<1x32x24xbf16, #tpu.memory_space<vmem>>, %arg6: memref<1x24xf32, #tpu.memory_space<vmem>>, %arg7: memref<1x4x24xf32, #tpu.memory_space<vmem>>) attributes {dimension_semantics = [#tpu.dimension_semantics<parallel>, #tpu.dimension_semantics<parallel>], iteration_bounds = array<i64: 2, 1>, scalar_prefetch = 0 : i64, scratch_operands = 0 : i64, tpu.core_type = #tpu.core_type<tc>, window_params = [{transform_indices = @transform_0, window_bounds = array<i64: 1, 4, 768>}, {pipeline_mode = #tpu.pipeline_mode<synchronous>, transform_indices = @transform_1, window_bounds = array<i64: 768, 32>}, {pipeline_mode = #tpu.pipeline_mode<synchronous>, transform_indices = @transform_2, window_bounds = array<i64: 1, 32>}, {transform_indices = @transform_3, window_bounds = array<i64: 1, 32, 24>}, {pipeline_mode = #tpu.pipeline_mode<synchronous>, transform_indices = @transform_4, window_bounds = array<i64: 1, 24>}, {transform_indices = @transform_5, window_bounds = array<i64: 1, 4, 24>}]} {
    %c0 = arith.constant 0 : index
    %c0_0 = arith.constant 0 : index
    %c0_1 = arith.constant 0 : index
    %0 = vector.load %arg2[%c0, %c0_0, %c0_1] : memref<1x4x768xbf16, #tpu.memory_space<vmem>>, vector<1x4x768xbf16>
    %1 = vector.shape_cast %0 : vector<1x4x768xbf16> to vector<4x768xbf16>
    %c0_2 = arith.constant 0 : index
    %c0_3 = arith.constant 0 : index
    %2 = vector.load %arg3[%c0_2, %c0_3] : memref<768x32xbf16, #tpu.memory_space<vmem>>, vector<768x32xbf16>
    %cst = arith.constant dense<0.000000e+00> : vector<4x32xf32>
    %3 = tpu.matmul %1, %2, %cst {dimension_numbers = #tpu.dot_dimension_numbers<[1], [0], [0], [1], [0, 0, 1, 1], [], []>} : vector<4x768xbf16>, vector<768x32xbf16>, vector<4x32xf32> -> vector<4x32xf32>
    %c0_4 = arith.constant 0 : index
    %c0_5 = arith.constant 0 : index
    %4 = vector.load %arg4[%c0_4, %c0_5] : memref<1x32xf32, #tpu.memory_space<vmem>>, vector<1x32xf32>
    %5 = vector.broadcast %4 : vector<1x32xf32> to vector<4x32xf32>
    %6 = arith.addf %3, %5 : vector<4x32xf32>
    %cst_6 = arith.constant 0.000000e+00 : f32
    %7 = vector.broadcast %cst_6 : f32 to vector<4x32xf32>
    %8 = arith.maximumf %6, %7 : vector<4x32xf32>
    %9 = arith.truncf %8 : vector<4x32xf32> to vector<4x32xbf16>
    %c0_7 = arith.constant 0 : index
    %c0_8 = arith.constant 0 : index
    %c0_9 = arith.constant 0 : index
    %10 = vector.load %arg5[%c0_7, %c0_8, %c0_9] : memref<1x32x24xbf16, #tpu.memory_space<vmem>>, vector<1x32x24xbf16>
    %11 = vector.shape_cast %10 : vector<1x32x24xbf16> to vector<32x24xbf16>
    %cst_10 = arith.constant dense<0.000000e+00> : vector<4x24xf32>
    %12 = tpu.matmul %9, %11, %cst_10 {dimension_numbers = #tpu.dot_dimension_numbers<[1], [0], [0], [1], [0, 0, 1, 1], [], []>} : vector<4x32xbf16>, vector<32x24xbf16>, vector<4x24xf32> -> vector<4x24xf32>
    %c0_11 = arith.constant 0 : index
    %c0_12 = arith.constant 0 : index
    %13 = vector.load %arg6[%c0_11, %c0_12] : memref<1x24xf32, #tpu.memory_space<vmem>>, vector<1x24xf32>
    %14 = vector.broadcast %13 : vector<1x24xf32> to vector<4x24xf32>
    %15 = arith.addf %12, %14 : vector<4x24xf32>
    %c0_13 = arith.constant 0 : index
    %c0_14 = arith.constant 0 : index
    %c0_15 = arith.constant 0 : index
    %16 = vector.load %arg7[%c0_13, %c0_14, %c0_15] : memref<1x4x24xf32, #tpu.memory_space<vmem>>, vector<1x4x24xf32>
    %17 = vector.shape_cast %16 : vector<1x4x24xf32> to vector<4x24xf32>
    %18 = vector.shape_cast %15 : vector<4x24xf32> to vector<1x4x24xf32>
    tpu.vector_store %arg7[%c0_13, %c0_14, %c0_15], %18 {strides = array<i32>} : memref<1x4x24xf32, #tpu.memory_space<vmem>>, vector<1x4x24xf32>,
    return
  }
  func.func @transform_0(%arg0: i32, %arg1: i32) -> (i32, i32, i32) {
    %c0_i32 = arith.constant 0 : i32
    %c0_i32_0 = arith.constant 0 : i32
    return %arg0, %arg1, %c0_i32 : i32, i32, i32
  }
  func.func @transform_1(%arg0: i32, %arg1: i32) -> (i32, i32) {
    %c0_i32 = arith.constant 0 : i32
    %c0_i32_0 = arith.constant 0 : i32
    %c0_i32_1 = arith.constant 0 : i32
    return %c0_i32, %c0_i32_0 : i32, i32
  }
  func.func @transform_2(%arg0: i32, %arg1: i32) -> (i32, i32) {
    %c0_i32 = arith.constant 0 : i32
    %c0_i32_0 = arith.constant 0 : i32
    %c0_i32_1 = arith.constant 0 : i32
    return %c0_i32, %c0_i32_0 : i32, i32
  }
  func.func @transform_3(%arg0: i32, %arg1: i32) -> (i32, i32, i32) {
    %c0_i32 = arith.constant 0 : i32
    %c0_i32_0 = arith.constant 0 : i32
    %c0_i32_1 = arith.constant 0 : i32
    return %arg0, %c0_i32, %c0_i32_0 : i32, i32, i32
  }
  func.func @transform_4(%arg0: i32, %arg1: i32) -> (i32, i32) {
    %c0_i32 = arith.constant 0 : i32
    %c0_i32_0 = arith.constant 0 : i32
    %c0_i32_1 = arith.constant 0 : i32
    return %c0_i32, %c0_i32_0 : i32, i32
  }
  func.func @transform_5(%arg0: i32, %arg1: i32) -> (i32, i32, i32) {
    %c0_i32 = arith.constant 0 : i32
    %c0_i32_0 = arith.constant 0 : i32
    return %arg0, %arg1, %c0_i32 : i32, i32, i32
  }
}

module attributes {stable_mosaic.version = 11 : i64} {
  func.func @_head_kernel(%arg0: i32, %arg1: i32, %arg2: memref<1x1x3072xbf16, #tpu.memory_space<vmem>>, %arg3: memref<3072x32xbf16, #tpu.memory_space<vmem>>, %arg4: memref<1x32xf32, #tpu.memory_space<vmem>>, %arg5: memref<1x32x24xbf16, #tpu.memory_space<vmem>>, %arg6: memref<1x24xf32, #tpu.memory_space<vmem>>, %arg7: memref<1x1x24xf32, #tpu.memory_space<vmem>>) attributes {dimension_semantics = [#tpu.dimension_semantics<parallel>, #tpu.dimension_semantics<parallel>], iteration_bounds = array<i64: 2, 1>, scalar_prefetch = 0 : i64, scratch_operands = 0 : i64, tpu.core_type = #tpu.core_type<tc>, window_params = [{transform_indices = @transform_0, window_bounds = array<i64: 1, 1, 3072>}, {pipeline_mode = #tpu.pipeline_mode<synchronous>, transform_indices = @transform_1, window_bounds = array<i64: 3072, 32>}, {pipeline_mode = #tpu.pipeline_mode<synchronous>, transform_indices = @transform_2, window_bounds = array<i64: 1, 32>}, {transform_indices = @transform_3, window_bounds = array<i64: 1, 32, 24>}, {pipeline_mode = #tpu.pipeline_mode<synchronous>, transform_indices = @transform_4, window_bounds = array<i64: 1, 24>}, {transform_indices = @transform_5, window_bounds = array<i64: 1, 1, 24>}]} {
    %c0 = arith.constant 0 : index
    %c0_0 = arith.constant 0 : index
    %c0_1 = arith.constant 0 : index
    %0 = vector.load %arg2[%c0, %c0_0, %c0_1] : memref<1x1x3072xbf16, #tpu.memory_space<vmem>>, vector<1x1x3072xbf16>
    %1 = vector.shape_cast %0 : vector<1x1x3072xbf16> to vector<1x3072xbf16>
    %c0_2 = arith.constant 0 : index
    %c0_3 = arith.constant 0 : index
    %2 = vector.load %arg3[%c0_2, %c0_3] : memref<3072x32xbf16, #tpu.memory_space<vmem>>, vector<3072x32xbf16>
    %cst = arith.constant dense<0.000000e+00> : vector<1x32xf32>
    %3 = tpu.matmul %1, %2, %cst {dimension_numbers = #tpu.dot_dimension_numbers<[1], [0], [0], [1], [0, 0, 1, 1], [], []>} : vector<1x3072xbf16>, vector<3072x32xbf16>, vector<1x32xf32> -> vector<1x32xf32>
    %c0_4 = arith.constant 0 : index
    %c0_5 = arith.constant 0 : index
    %4 = vector.load %arg4[%c0_4, %c0_5] : memref<1x32xf32, #tpu.memory_space<vmem>>, vector<1x32xf32>
    %5 = arith.addf %3, %4 : vector<1x32xf32>
    %cst_6 = arith.constant 0.000000e+00 : f32
    %6 = vector.broadcast %cst_6 : f32 to vector<1x32xf32>
    %7 = arith.maximumf %5, %6 : vector<1x32xf32>
    %8 = arith.truncf %7 : vector<1x32xf32> to vector<1x32xbf16>
    %c0_7 = arith.constant 0 : index
    %c0_8 = arith.constant 0 : index
    %c0_9 = arith.constant 0 : index
    %9 = vector.load %arg5[%c0_7, %c0_8, %c0_9] : memref<1x32x24xbf16, #tpu.memory_space<vmem>>, vector<1x32x24xbf16>
    %10 = vector.shape_cast %9 : vector<1x32x24xbf16> to vector<32x24xbf16>
    %cst_10 = arith.constant dense<0.000000e+00> : vector<1x24xf32>
    %11 = tpu.matmul %8, %10, %cst_10 {dimension_numbers = #tpu.dot_dimension_numbers<[1], [0], [0], [1], [0, 0, 1, 1], [], []>} : vector<1x32xbf16>, vector<32x24xbf16>, vector<1x24xf32> -> vector<1x24xf32>
    %c0_11 = arith.constant 0 : index
    %c0_12 = arith.constant 0 : index
    %12 = vector.load %arg6[%c0_11, %c0_12] : memref<1x24xf32, #tpu.memory_space<vmem>>, vector<1x24xf32>
    %13 = arith.addf %11, %12 : vector<1x24xf32>
    %c0_13 = arith.constant 0 : index
    %c0_14 = arith.constant 0 : index
    %c0_15 = arith.constant 0 : index
    %14 = vector.load %arg7[%c0_13, %c0_14, %c0_15] : memref<1x1x24xf32, #tpu.memory_space<vmem>>, vector<1x1x24xf32>
    %15 = vector.shape_cast %14 : vector<1x1x24xf32> to vector<1x24xf32>
    %16 = vector.shape_cast %13 : vector<1x24xf32> to vector<1x1x24xf32>
    tpu.vector_store %arg7[%c0_13, %c0_14, %c0_15], %16 {strides = array<i32>} : memref<1x1x24xf32, #tpu.memory_space<vmem>>, vector<1x1x24xf32>,
    return
  }
  func.func @transform_0(%arg0: i32, %arg1: i32) -> (i32, i32, i32) {
    %c0_i32 = arith.constant 0 : i32
    %c0_i32_0 = arith.constant 0 : i32
    return %arg0, %arg1, %c0_i32 : i32, i32, i32
  }
  func.func @transform_1(%arg0: i32, %arg1: i32) -> (i32, i32) {
    %c0_i32 = arith.constant 0 : i32
    %c0_i32_0 = arith.constant 0 : i32
    %c0_i32_1 = arith.constant 0 : i32
    return %c0_i32, %c0_i32_0 : i32, i32
  }
  func.func @transform_2(%arg0: i32, %arg1: i32) -> (i32, i32) {
    %c0_i32 = arith.constant 0 : i32
    %c0_i32_0 = arith.constant 0 : i32
    %c0_i32_1 = arith.constant 0 : i32
    return %c0_i32, %c0_i32_0 : i32, i32
  }
  func.func @transform_3(%arg0: i32, %arg1: i32) -> (i32, i32, i32) {
    %c0_i32 = arith.constant 0 : i32
    %c0_i32_0 = arith.constant 0 : i32
    %c0_i32_1 = arith.constant 0 : i32
    return %arg0, %c0_i32, %c0_i32_0 : i32, i32, i32
  }
  func.func @transform_4(%arg0: i32, %arg1: i32) -> (i32, i32) {
    %c0_i32 = arith.constant 0 : i32
    %c0_i32_0 = arith.constant 0 : i32
    %c0_i32_1 = arith.constant 0 : i32
    return %c0_i32, %c0_i32_0 : i32, i32
  }
  func.func @transform_5(%arg0: i32, %arg1: i32) -> (i32, i32, i32) {
    %c0_i32 = arith.constant 0 : i32
    %c0_i32_0 = arith.constant 0 : i32
    return %arg0, %arg1, %c0_i32 : i32, i32, i32
  }
}

</mosaic_0001>

<bundles_post_ra>
// kernel: model_exporter_forward.3
= control target key start
LH: loop header
LB: loop body
LE: loop exit
PB: predicated region body
PF: predicated region fallthrough
CT: control target
= control target key end

     0   :  { %10 = vsyncpa [#allocation3], 0  ;;  %s1024_s0 = inlined_call_operand.vmem [shape: bf16[2,16,192], index: 0, kind: input, shape index: {}]   ;;  %s1025_s1 = inlined_call_operand.vmem [shape: bf16[192,32], index: 1, kind: input, shape index: {}]   ;;  %s1026_s2 = inlined_call_operand.vmem [shape: f32[1,32], index: 2, kind: input, shape index: {}]   ;;  %s1027_s3 = inlined_call_operand.vmem [shape: bf16[2,32,24], index: 3, kind: input, shape index: {}]   ;;  %s1028_s4 = inlined_call_operand.vmem [shape: f32[1,24], index: 4, kind: input, shape index: {}]   ;;  %s1029_s5 = inlined_call_operand.hbm [shape: f32[2,16,24], index: 5, kind: output, shape index: {}]  }
   0x1   :  { %12 = vsyncpa [#allocation3 + $0x1], 0  ;;  %s861_s18 = smov 0   ;;  %s863_s19 = smov 0  }
   0x2   :  { %s865_s20 = smov 0   ;;  %s867_s21 = smov 0  }
   0x3   :  { %s869_s22 = smov 0   ;;  %s871_s23 = smov 0  }
   0x4 LB: > { %s621_s24 = sadd.s32 4294967295, %s823_s23   ;;  %s622_s25 = sadd.s32 4294967294, %s823_s23   ;;  %s823_s23 = sphi %s871_s23, %s18_s23   ;;  %s819_s22 = sphi %s869_s22, %s1036_s22   ;;  %s815_s21 = sphi %s867_s21, %s1035_s21   ;;  %s811_s20 = sphi %s865_s20, %s1034_s20   ;;  %s807_s19 = sphi %s863_s19, %s1033_s19   ;;  %s803_s18 = sphi %s861_s18, %s1032_s18  }
   0x5   : > { %s30_s26 = sadd.s32 1, %s819_s22  ;;  %s156_s27 = sadd.s32 1, %s811_s20 }
   0x6   : > { %p32_p0 = scmp.ge.s32.totalorder %s30_s26, 2  ;;  %p166_p1 = scmp.ne.s32.totalorder %s811_s20, %s807_s19 }
   0x7   : > { %p167_p2 = scmp.eq.s32.totalorder %s621_s24, 1  ;;  %p172_p3 = scmp.ne.s32.totalorder %s807_s19, %s803_s18 }
   0x8   : > { %s1038_s26 = smov (%p32_p0, %s30_s26), 0  ;;  %p173_p5 = scmp.eq.s32.totalorder %s622_s25, 1 }
   0x9   : > { %p901_p4 = por %p167_p2, %p166_p1  ;;  %s151_s29 = ssub.s32 %s819_s22, %s1038_s26 }
   0xa   : > { %p625_p6 = scmp.ge.s32.totalorder %s823_s23, 1  ;;  %p154_p7 = scmp.eq.s32.totalorder %s151_s29, 0 }
   0xb   : > { %p908_p8 = por %p173_p5, %p172_p3  ;;  %p222_p9 = scmp.lt.s32.totalorder %s823_s23, 3 }
   0xc   : > { %s914_s6 = scalar_select %p154_p7, %s811_s20, %s156_s27  }
   0xd   : > { %p223_p10 = pnand %p625_p6, %p222_p9 }
   0xe   : > { %p261_p11 = scmp.lt.s32.totalorder (!%p223_p10), %s815_s21, 1  ;;  %s658_s17 = sshll.u32 (!%p223_p10), %s815_s21, 8 }
   0xf   : > { %226 = sbr.rel (%p223_p10) target bundleno = 485 (0x1e5), region = 40  ;;  %s977_s29 = scalar_lea.hbm (!%p223_p10), %s1029_s5, %s658_s17 }
  0x14   : > { %v730_v0 = vld [vmem:[%s1025_s1 + $0x38] sm:$0xff]   ;;  %v825_v1 = vmov 0   ;;  %v731_v2 = vld [vmem:[%s1025_s1 + $0x30] sm:$0xff]   ;;  %s262_s11 = scalar_select %p261_p11, %s815_s21, 1  ;;  %v732_v3 = vld [vmem:[%s1025_s1 + $0x28] sm:$0xff]   ;;  %vm392_vm0 = vcmask 523264  }
  0x15   : > { %396 = vmatprep.subr.bf16.mxu0 %v825_v1  ;;  %v733_v4 = vld [vmem:[%s1025_s1 + $0x20] sm:$0xff]   ;;  %v734_v5 = vld [vmem:[%s1025_s1 + $0x18] sm:$0xff]   ;;  %v735_v7 = vld [vmem:[%s1025_s1 + $0x10] sm:$0xff]   ;;  %v826_v16 = vmov 0.0   ;;  %vm827_vm1 = vmmov 0   ;;  %vm463_vm2 = vcmask 261120  }
  0x16   : > { %397 = vmatpush1.bf16.msra.mxu0 %v730_v0  ;;  %s656_s14 = sshll.u32 %s262_s11, 4  ;;  %v736_v8 = vld [vmem:[%s1025_s1 + $0x8] sm:$0xff]   ;;  %v737_v9 = vld [vmem:[%s1025_s1] sm:$0xff]   ;;  %v738_v10 = vld [vmem:[%s1025_s1 + $0x58] sm:$0xff]   ;;  %662 = vmatprep.subr.bf16.mxu1 %v826_v16  ;;  %vm508_vm3 = vcmask 195584   ;;  %s828_s21 = smov [#allocation2]  }
  0x17   : > { %398 = vmatprep.subr.bf16.mxu0 %v825_v1  ;;  %s269_s25 = scalar_lea.vmem %s1024_s0, %s656_s14  ;;  %s936_s7 = scalar_lea.vmem %s1027_s3, %s656_s14  ;;  %v739_v11 = vld [vmem:[%s1025_s1 + $0x50] sm:$0xff]   ;;  %v740_v12 = vld [vmem:[%s1025_s1 + $0x48] sm:$0xff]   ;;  %v741_v13 = vld [vmem:[%s1025_s1 + $0x40] sm:$0xff]   ;;  %666 = vmatprep.mubr.msk.bf16.mxu1 %vm827_vm1, %v826_v16 }
  0x18   : > { %v744_v6 = vld [vmem:[%s269_s25 + $0x4] ss:$8 sps:$4 sm:$0xff]   ;;  %v742_v14 = vld [vmem:[%s269_s25] ss:$8 sps:$4 sm:$0xff]   ;;  %s257_s25 = sand.u32 1, %s807_s19   ;;  %s751_s10 = sshll.u32 %s828_s21, 4  ;;  %s752_s10 = int_to_ptr.vmem [resolvable:$false] %s751_s10 }
  0x19   : > { %646 = vmatprep.mubr.msk.bf16.mxu0 %vm392_vm0, %v744_v6  ;;  %v745_v15 = vld [vmem:[%s936_s7 + $0x8] sm:$0xff]   ;;  %v746_v17 = vld [vmem:[%s936_s7] sm:$0xff]   ;;  %s626_s7 = sshll.u32 %s257_s25, 4  ;;  %s979_s8 = scalar_lea.sflag [#allocation3], %s257_s25 }
  0x1a   : > { %399 = vmatpush1.bf16.msra.mxu0 %v731_v2  ;;  %663 = vmatpush3.bf16.msra.mxu1 %v745_v15  ;;  %v631_v18 = vld [vmem:[%s1026_s2] ss:$0 sm:$0xff]  ;;  %s259_s15 = scalar_lea.vmem [#allocation2], %s626_s7  ;;  %s753_s11 = scalar_lea.vmem %s752_s10, 512 }
  0x1b   : > { %400 = vmatprep.subr.bf16.mxu0 %v825_v1  ;;  %664 = vmatprep.subr.bf16.mxu1 %v826_v16  ;;  %v647_v28 = vld [vmem:[%s1028_s4] ss:$0 sm:$0xff]  ;;  %s527_s16 = sshll.u32 %s259_s15, 4  ;;  %s972_s16 = int_to_ptr.vmem [resolvable:$true] %s527_s16 }
  0x1c   : > { %s747_s9 = scalar_lea.vmem %s972_s16, 256  ;;  %p754_p1 = scmp.lt.s32.totalorder %s972_s16, %s752_s10 }
  0x1d   : > { %p748_p12 = scmp.ne.s32.totalorder %s972_s16, %s747_s9  ;;  %p755_p2 = scmp.lt.s32.totalorder %s753_s11, %s747_s9 }
  0x1e   : > { %401 = vmatpush1.bf16.msra.mxu0 %v732_v3  ;;  %665 = vmatpush3.bf16.msra.mxu1 %v746_v17 }
  0x1f   : > { %402 = vmatprep.subr.bf16.mxu0 %v825_v1  ;;  %p749_p13 = pnand %p748_p12, %p901_p4  ;;  %p756_p3 = por %p755_p2, %p754_p1 }
  0x21   : > { %p750_p0 = pneg %p749_p13 }
  0x22   : > { %403 = vmatpush1.bf16.msra.mxu0 %v733_v4 }
  0x23   : > { %404 = vmatprep.subr.bf16.mxu0 %v825_v1  ;;  %p757_p5 = pnand %p756_p3, %p750_p0 }
  0x26   : > { %405 = vmatpush1.bf16.msra.mxu0 %v734_v5 }
  0x27   : > { %406 = vmatprep.subr.bf16.mxu0 %v825_v1 }
  0x2a   : > { %407 = vmatpush1.bf16.msra.mxu0 %v735_v7 }
  0x2b   : > { %408 = vmatprep.subr.bf16.mxu0 %v825_v1 }
  0x2e   : > { %409 = vmatpush1.bf16.msra.mxu0 %v736_v8 }
  0x2f   : > { %410 = vmatprep.subr.bf16.mxu0 %v825_v1 }
  0x32   : > { %411 = vmatpush1.bf16.msra.mxu0 %v737_v9 }
  0x33   : > { %420 = vmatprep.subr.bf16.mxu0 %v825_v1 }
  0x36   : > { %421 = vmatpush2.bf16.msra.mxu0 %v738_v10 }
  0x37   : > { %422 = vmatprep.subr.bf16.mxu0 %v825_v1 }
  0x3a   : > { %423 = vmatpush2.bf16.msra.mxu0 %v739_v11 }
  0x3b   : > { %424 = vmatprep.subr.bf16.mxu0 %v825_v1 }
  0x3e   : > { %425 = vmatpush2.bf16.msra.mxu0 %v740_v12 }
  0x3f   : > { %426 = vmatprep.subr.bf16.mxu0 %v825_v1 }
  0x42   : > { %427 = vmatpush2.bf16.msra.mxu0 %v741_v13 }
  0x45   : > { %429 = vmatmul.mubr.bf16.vlgmr.msra.gmra.mxu0 %v742_v14 }
 0x105   : > { %v430_v19 = vpop.f32.mrf.mxu0 }
 0x106   : > { %v431_v21 = vadd.f32 %v631_v18, %v430_v19 }
 0x107   : > { %v432_v20 = vpop.f32.mrf.mxu0 }
 0x108   : > { %v437_v25 = vmax.f32 %v431_v21, 0.0 }
 0x109   : > { %v433_v22 = vpop.f32.mrf.mxu0 }
 0x10a   : > { %v434_v23 = vadd.f32 %v631_v18, %v433_v22 }
 0x10b   : > { %v435_v24 = vpop.f32.mrf.mxu0 }
 0x10c   : > { %v438_v26 = vmax.f32 %v434_v23, 0.0 }
 0x10e   : > { %v439_v27 = vpack.c.bf16 %v438_v26, %v437_v25 }
 0x110   : > { %667 = vmatmul.mubr.msk.bf16.vlgmr.msra.gmra.mxu1 %vm463_vm2, %v439_v27 }
 0x1d0   : > { %v501_v29 = vpop.f32.mrf.mxu1 }
 0x1d1   : > { %v502_v30 = vadd.f32 %v647_v28, %v501_v29 }
 0x1d2   : > { %v668_v31 = vpop.f32.mrf.mxu1 }
 0x1d3   : > { %509 = vst.msk [vmem:[%s259_s15] sm:$0xff] %vm508_vm3, %v502_v30 }
 0x1d4   : > { %v504_v32 = vpop.f32.mrf.mxu1 }
 0x1d5   : > { %v505_v33 = vadd.f32 %v647_v28, %v504_v32 }
 0x1d6   : > { %v669_v34 = vpop.f32.mrf.mxu1 }
 0x1d7   : > { %510 = vst.msk [vmem:[%s259_s15 + $0x8] sm:$0xff] %vm508_vm3, %v505_v33 }
 0x1d8   : > { %760 = shalt.err (!%p757_p5)
}
 0x1d9   : > { %s761_s12 = scalar_lea.hbm %s977_s29, 256  ;;  %s765_s13 = scalar_lea.hbm %s1029_s5, 512 }
 0x1da   : > { %p762_p6 = scmp.ne.s32.totalorder %s977_s29, %s761_s12  ;;  %p766_p10 = scmp.lt.s32.totalorder %s977_s29, %s1029_s5 }
 0x1db   : > { %p767_p11 = scmp.lt.s32.totalorder %s765_s13, %s761_s12 }
 0x1dc   : > { %p763_p7 = pnand %p762_p6, %p901_p4 }
 0x1dd   : > { %p768_p12 = por %p767_p11, %p766_p10 }
 0x1de   : > { %p764_p9 = pneg %p763_p7 }
 0x1e0   : > { %p769_p13 = pnand %p768_p12, %p764_p9 }
 0x1e2   : > { %772 = shalt.err (!%p769_p13)
}
 0x1e3   : > { %s829_s17 = smov 128   ;;  %s830_s24 = smov 8  }
 0x1e4   : > { %670 = dma.vmem_to_hbm [thread:$0]  (%p901_p4), %s972_s16, 256, %s977_s29, %s979_s8, %s829_s17, %s829_s17, %s830_s24  }
 0x1e5 PF: > { %p676_p0 = scmp.ge.s32.totalorder %s823_s23, 2  ;;  %s542_s27 = sand.u32 1, %s803_s18  }
 0x1e6   : > { %s543_s9 = scalar_lea.sflag [#allocation3], %s542_s27 }
 0x1e7   : > { %p673_p1 = pnand %p676_p0, %p908_p8 }
 0x1e9   : > { %p674_p2 = pneg %p673_p1 }
 0x1eb   : > { %798 = dma.done.wait (%p674_p2), %s543_s9, 256  }
 0x1ec   : > { %800 = vsyncadd (%p674_p2), %s543_s9, 4294967040  ;;  %s18_s23 = sadd.s32 1, %s823_s23   ;;  %s1032_s18 = smov %s807_s19 }
 0x1ed   : > { %p15_p3 = scmp.ge.s32.totalorder %s18_s23, 4   ;;  %s1033_s19 = smov %s811_s20 }
 0x1ee   : > { %s1034_s20 = smov %s914_s6  ;;  %s1035_s21 = smov %s819_s22 }
 0x1ef   : > { %s1036_s22 = smov %s1038_s26  ;;  %17 = sbr.rel (!%p15_p3) target bundleno = 4 (0x4), region = 78 }
 0x1f4   :  { %548 = vsyncpa [#allocation3], 1 }
 0x1f5   :  { %550 = vsyncpa [#allocation3 + $0x1], 1 }

// kernel: model_exporter_forward.4
= control target key start
LH: loop header
LB: loop body
LE: loop exit
PB: predicated region body
PF: predicated region fallthrough
CT: control target
= control target key end

     0   :  { %10 = vsyncpa [#allocation3], 0  ;;  %s1636_s0 = inlined_call_operand.vmem [shape: bf16[2,4,768], index: 0, kind: input, shape index: {}]   ;;  %s1637_s1 = inlined_call_operand.vmem [shape: bf16[768,32], index: 1, kind: input, shape index: {}]   ;;  %s1638_s2 = inlined_call_operand.vmem [shape: f32[1,32], index: 2, kind: input, shape index: {}]   ;;  %s1639_s3 = inlined_call_operand.vmem [shape: bf16[2,32,24], index: 3, kind: input, shape index: {}]   ;;  %s1640_s4 = inlined_call_operand.vmem [shape: f32[1,24], index: 4, kind: input, shape index: {}]   ;;  %s1641_s5 = inlined_call_operand.hbm [shape: f32[2,4,24], index: 5, kind: output, shape index: {}]  }
   0x1   :  { %12 = vsyncpa [#allocation3 + $0x1], 0  ;;  %s1360_s18 = smov 0   ;;  %s1362_s19 = smov 0  }
   0x2   :  { %s1364_s20 = smov 0   ;;  %s1366_s21 = smov 0  }
   0x3   :  { %s1368_s22 = smov 0   ;;  %s1370_s23 = smov 0  }
   0x4 LB: > { %s993_s24 = sadd.s32 4294967295, %s1324_s23   ;;  %s994_s25 = sadd.s32 4294967294, %s1324_s23   ;;  %s1324_s23 = sphi %s1370_s23, %s18_s23   ;;  %s1320_s22 = sphi %s1368_s22, %s1648_s22   ;;  %s1316_s21 = sphi %s1366_s21, %s1647_s21   ;;  %s1312_s20 = sphi %s1364_s20, %s1646_s20   ;;  %s1308_s19 = sphi %s1362_s19, %s1645_s19   ;;  %s1304_s18 = sphi %s1360_s18, %s1644_s18  }
   0x5   : > { %s30_s26 = sadd.s32 1, %s1320_s22  ;;  %s156_s27 = sadd.s32 1, %s1312_s20 }
   0x6   : > { %p32_p0 = scmp.ge.s32.totalorder %s30_s26, 2  ;;  %p166_p1 = scmp.ne.s32.totalorder %s1312_s20, %s1308_s19 }
   0x7   : > { %p167_p2 = scmp.eq.s32.totalorder %s993_s24, 1  ;;  %p172_p3 = scmp.ne.s32.totalorder %s1308_s19, %s1304_s18 }
   0x8   : > { %s1650_s26 = smov (%p32_p0, %s30_s26), 0  ;;  %p173_p5 = scmp.eq.s32.totalorder %s994_s25, 1 }
   0x9   : > { %p1400_p4 = por %p167_p2, %p166_p1  ;;  %s151_s29 = ssub.s32 %s1320_s22, %s1650_s26 }
   0xa   : > { %p997_p6 = scmp.ge.s32.totalorder %s1324_s23, 1  ;;  %p154_p7 = scmp.eq.s32.totalorder %s151_s29, 0 }
   0xb   : > { %p1407_p8 = por %p173_p5, %p172_p3  ;;  %p220_p9 = scmp.lt.s32.totalorder %s1324_s23, 3 }
   0xc   : > { %s1413_s6 = scalar_select %p154_p7, %s1312_s20, %s156_s27  }
   0xd   : > { %p221_p10 = pnand %p997_p6, %p220_p9 }
   0xe   : > { %p257_p11 = scmp.lt.s32.totalorder (!%p221_p10), %s1316_s21, 1  ;;  %s1057_s17 = sshll.u32 (!%p221_p10), %s1316_s21, 6 }
   0xf   : > { %224 = sbr.rel (%p221_p10) target bundleno = 497 (0x1f1), region = 40  ;;  %s1329_s9 = smov (!%p221_p10), [#allocation2]  }
  0x10   : > { %s1252_s11 = sshll.u32 (!%p221_p10), %s1329_s9, 4  ;;  %s1253_s11 = int_to_ptr.vmem [resolvable:$false] %s1252_s11 }
  0x14   : > { %v1197_v0 = vld [vmem:[%s1637_s1 + $0x78] sm:$0xff]   ;;  %v1201_v4 = vld [vmem:[%s1637_s1 + $0x70] sm:$0xff]   ;;  %v1205_v8 = vld [vmem:[%s1637_s1 + $0x68] sm:$0xff]   ;;  %s1480_s25 = scalar_select %p257_p11, %s1316_s21, 1  ;;  %v383_v27 = vlaneseq  ;;  %v1326_v35 = vmov 1983009808  }
  0x15   : > { %v1198_v1 = vld [vmem:[%s1637_s1 + $0x38] sm:$0xff]   ;;  %1061 = vmatprep.subr.bf16.mxu0 %v1197_v0  ;;  %v1202_v5 = vld [vmem:[%s1637_s1 + $0x30] sm:$0xff]   ;;  %v1206_v9 = vld [vmem:[%s1637_s1 + $0x28] sm:$0xff]   ;;  %v381_v36 = vunpack.c.l.s4 %v1326_v35  ;;  %v1327_v63 = vmov 0.0   ;;  %vm1328_vm0 = vmmov 0   ;;  %vm843_vm1 = vcmask 261120  }
  0x16   : > { %v1199_v2 = vld [vmem:[%s1637_s1 + $0xf8] sm:$0xff]   ;;  %1062 = vmatpush3.bf16.msra.mxu0 %v1198_v1  ;;  %v1203_v6 = vld [vmem:[%s1637_s1 + $0xf0] sm:$0xff]   ;;  %v1207_v10 = vld [vmem:[%s1637_s1 + $0xe8] sm:$0xff]   ;;  %s1138_s13 = smul.u32 12, %s1480_s25  ;;  %v384_v32 = vshrl.u32 %v383_v27, 7  ;;  %s1060_s12 = sshll.u32 %s1480_s25, 4 }
  0x17   : > { %v1200_v3 = vld [vmem:[%s1637_s1 + $0xb8] sm:$0xff]   ;;  %1083 = vmatprep.subr.bf16.mxu1 %v1199_v2  ;;  %1063 = vmatprep.subr.bf16.mxu0 %v1201_v4  ;;  %v1204_v7 = vld [vmem:[%s1637_s1 + $0xb0] sm:$0xff]   ;;  %v1208_v11 = vld [vmem:[%s1637_s1 + $0xa8] sm:$0xff]   ;;  %v382_v38 = vunpack.c.0.s8 %v381_v36  ;;  %vm887_vm2 = vcmask 191488   ;;  %s1590_s25 = scalar_lea.hbm %s1641_s5, %s1057_s17 }
  0x18   : > { %1084 = vmatpush3.bf16.msra.mxu1 %v1200_v3  ;;  %v1209_v12 = vld [vmem:[%s1637_s1 + $0x60] sm:$0xff]   ;;  %v1213_v16 = vld [vmem:[%s1637_s1 + $0x58] sm:$0xff]   ;;  %v1217_v20 = vld [vmem:[%s1637_s1 + $0x50] sm:$0xff]   ;;  %s1510_s10 = scalar_lea.vmem %s1636_s0, %s1138_s13  ;;  %s1541_s13 = scalar_lea.vmem %s1639_s3, %s1060_s12 }
  0x19   : > { %1085 = vmatprep.subr.bf16.mxu1 %v1203_v6  ;;  %v1210_v13 = vld [vmem:[%s1637_s1 + $0x20] sm:$0xff]   ;;  %v1214_v17 = vld [vmem:[%s1637_s1 + $0x18] sm:$0xff]   ;;  %v1218_v21 = vld [vmem:[%s1637_s1 + $0x10] sm:$0xff]   ;;  %v385_v40 = vsub.s32 %v382_v38, %v384_v32  ;;  %s1254_s12 = scalar_lea.vmem %s1253_s11, 128 }
  0x1a   : > { %1064 = vmatpush3.bf16.msra.mxu0 %v1202_v5  ;;  %v1211_v14 = vld [vmem:[%s1637_s1 + $0xe0] sm:$0xff]   ;;  %v1215_v18 = vld [vmem:[%s1637_s1 + $0xd8] sm:$0xff]   ;;  %v1219_v22 = vld [vmem:[%s1637_s1 + $0xd0] sm:$0xff]  }
  0x1b   : > { %1065 = vmatprep.subr.bf16.mxu0 %v1205_v8  ;;  %v1212_v15 = vld [vmem:[%s1637_s1 + $0xa0] sm:$0xff]   ;;  %v1216_v19 = vld [vmem:[%s1637_s1 + $0x98] sm:$0xff]   ;;  %v1220_v23 = vld [vmem:[%s1637_s1 + $0x90] sm:$0xff]  }
  0x1c   : > { %1086 = vmatpush3.bf16.msra.mxu1 %v1204_v7  ;;  %v1221_v24 = vld [vmem:[%s1637_s1 + $0x48] sm:$0xff]   ;;  %v1225_v29 = vld [vmem:[%s1637_s1 + $0x40] sm:$0xff]   ;;  %v1229_v37 = vld [vmem:[%s1637_s1 + $0x178] sm:$0xff]  }
  0x1d   : > { %1087 = vmatprep.subr.bf16.mxu1 %v1207_v10  ;;  %v1222_v25 = vld [vmem:[%s1637_s1 + $0x8] sm:$0xff]   ;;  %v1226_v30 = vld [vmem:[%s1637_s1] sm:$0xff]   ;;  %v1231_v45 = vld [vmem:[%s1637_s1 + $0x138] sm:$0xff]  }
  0x1e   : > { %1066 = vmatpush3.bf16.msra.mxu0 %v1206_v9  ;;  %v1223_v26 = vld [vmem:[%s1637_s1 + $0xc8] sm:$0xff]   ;;  %v1227_v31 = vld [vmem:[%s1637_s1 + $0xc0] sm:$0xff]   ;;  %v1232_v46 = vld [vmem:[%s1637_s1 + $0x170] sm:$0xff]  }
  0x1f   : > { %1067 = vmatprep.subr.bf16.mxu0 %v1209_v12  ;;  %v1224_v28 = vld [vmem:[%s1637_s1 + $0x88] sm:$0xff]   ;;  %v272_v33 = vld [vmem:[%s1510_s10] sm:$0xff]  ;;  %v1233_v47 = vld [vmem:[%s1637_s1 + $0x130] sm:$0xff]  }
  0x20   : > { %1088 = vmatpush3.bf16.msra.mxu1 %v1208_v11  ;;  %v1228_v34 = vld [vmem:[%s1637_s1 + $0x80] sm:$0xff]   ;;  %v379_v39 = vcombine.high %v272_v33, %v272_v33  ;;  %v386_v41 = vrot.slane %v272_v33, %v385_v40  ;;  %v1234_v48 = vld [vmem:[%s1637_s1 + $0x168] sm:$0xff]   ;;  %v1238_v54 = vld [vmem:[%s1637_s1 + $0x158] sm:$0xff]  }
  0x21   : > { %1089 = vmatprep.subr.bf16.mxu1 %v1211_v14  ;;  %v1235_v49 = vld [vmem:[%s1637_s1 + $0x128] sm:$0xff]   ;;  %v1236_v50 = vld [vmem:[%s1637_s1 + $0x160] sm:$0xff]   ;;  %v1239_v55 = vld [vmem:[%s1637_s1 + $0x118] sm:$0xff]  }
  0x22   : > { %1068 = vmatpush3.bf16.msra.mxu0 %v1210_v13  ;;  %v393_v42 = vrot.slane %v379_v39, %v385_v40  ;;  %v394_v43 = vcombine.high %v386_v41, %v386_v41  ;;  %v1003_v51 = vld.sshfl [vmem:[%s1510_s10 + $0x8] sm:$0x33 pattern:$0x76325410]  ;;  %v1237_v53 = vld [vmem:[%s1637_s1 + $0x120] sm:$0xff]   ;;  %v1240_v56 = vld [vmem:[%s1637_s1 + $0x150] sm:$0xff]  }
  0x23   : > { %1069 = vmatprep.subr.bf16.mxu0 %v1213_v16  ;;  %v403_v52 = vcombine.high %v1003_v51, %v1003_v51  ;;  %v1241_v57 = vld [vmem:[%s1637_s1 + $0x110] sm:$0xff]   ;;  %v1242_v58 = vld [vmem:[%s1637_s1 + $0x148] sm:$0xff]   ;;  %v1244_v60 = vld [vmem:[%s1637_s1 + $0x140] sm:$0xff]  }
  0x24   : > { %1090 = vmatpush3.bf16.msra.mxu1 %v1212_v15  ;;  %v395_v44 = vcombine.high %v393_v42, %v393_v42  ;;  %730 = vmatprep.mubr.bf16.mxu0 %v394_v43  ;;  %v1243_v59 = vld [vmem:[%s1637_s1 + $0x108] sm:$0xff]   ;;  %v1245_v61 = vld [vmem:[%s1637_s1 + $0x100] sm:$0xff]  }
  0x25   : > { %1091 = vmatprep.subr.bf16.mxu1 %v1215_v18  ;;  %v1246_v62 = vld [vmem:[%s1541_s13 + $0x8] sm:$0xff]   ;;  %v1247_v0 = vld [vmem:[%s1541_s13] sm:$0xff]   ;;  %s254_s13 = sand.u32 1, %s1308_s19  }
  0x26   : > { %1070 = vmatpush3.bf16.msra.mxu0 %v1214_v17  ;;  %770 = vmatprep.mubr.bf16.mxu1 %v395_v44  ;;  %v1002_v10 = vld [vmem:[%s1638_s2] ss:$0 sm:$0xff]  ;;  %s998_s10 = sshll.u32 %s254_s13, 2  ;;  %s890_s8 = scalar_lea.sflag [#allocation3], %s254_s13 }
  0x27   : > { %1071 = vmatprep.subr.bf16.mxu0 %v1217_v20  ;;  %s256_s24 = scalar_lea.vmem [#allocation2], %s998_s10 }
  0x28   : > { %1092 = vmatpush3.bf16.msra.mxu1 %v1216_v19  ;;  %s904_s27 = sshll.u32 %s256_s24, 4  ;;  %s1592_s27 = int_to_ptr.vmem [resolvable:$true] %s904_s27 }
  0x29   : > { %1093 = vmatprep.subr.bf16.mxu1 %v1219_v22  ;;  %v1052_v22 = vld [vmem:[%s1640_s4] ss:$0 sm:$0xff]  ;;  %s1248_s21 = scalar_lea.vmem %s1592_s27, 64  ;;  %p1255_p1 = scmp.lt.s32.totalorder %s1592_s27, %s1253_s11 }
  0x2a   : > { %1072 = vmatpush3.bf16.msra.mxu0 %v1218_v21  ;;  %p1249_p12 = scmp.ne.s32.totalorder %s1592_s27, %s1248_s21  ;;  %p1256_p2 = scmp.lt.s32.totalorder %s1254_s12, %s1248_s21 }
  0x2b   : > { %1073 = vmatprep.subr.bf16.mxu0 %v1221_v24 }
  0x2c   : > { %1094 = vmatpush3.bf16.msra.mxu1 %v1220_v23  ;;  %p1250_p13 = pnand %p1249_p12, %p1400_p4  ;;  %p1257_p3 = por %p1256_p2, %p1255_p1 }
  0x2d   : > { %1095 = vmatprep.subr.bf16.mxu1 %v1223_v26 }
  0x2e   : > { %1074 = vmatpush3.bf16.msra.mxu0 %v1222_v25  ;;  %p1251_p0 = pneg %p1250_p13 }
  0x2f   : > { %1075 = vmatprep.subr.bf16.mxu0 %v1225_v29 }
  0x30   : > { %1096 = vmatpush3.bf16.msra.mxu1 %v1224_v28  ;;  %p1258_p5 = pnand %p1257_p3, %p1251_p0 }
  0x31   : > { %1097 = vmatprep.subr.bf16.mxu1 %v1227_v31 }
  0x32   : > { %1076 = vmatpush3.bf16.msra.mxu0 %v1226_v30 }
  0x33   : > { %1105 = vmatprep.subr.bf16.mxu0 %v1229_v37 }
  0x34   : > { %1098 = vmatpush3.bf16.msra.mxu1 %v1228_v34 }
  0x35   : > { %731 = vmatmul.mubr.bf16.vlgmr.msra.gmra.mxu0 %v386_v41  ;;  %1130 = vmatprep.subr.bf16.mxu1 %v1327_v63 }
  0x36   : > { %1106 = vmatpush3.bf16.msra.mxu0 %v1231_v45  ;;  %810 = vmatprep.mubr.bf16.mxu0 %v403_v52 }
  0x37   : > { %771 = vmatmul.mubr.bf16.vlgmr.msra.gmra.mxu1 %v393_v42  ;;  %1107 = vmatprep.subr.bf16.mxu0 %v1232_v46 }
  0x38   : > { %1131 = vmatpush3.bf16.msra.mxu1 %v1246_v62  ;;  %1134 = vmatprep.mubr.msk.bf16.mxu1 %vm1328_vm0, %v1327_v63 }
  0x39   : > { %1132 = vmatprep.subr.bf16.mxu1 %v1327_v63 }
  0x3a   : > { %1108 = vmatpush3.bf16.msra.mxu0 %v1233_v47 }
  0x3b   : > { %1109 = vmatprep.subr.bf16.mxu0 %v1234_v48 }
  0x3c   : > { %1133 = vmatpush3.bf16.msra.mxu1 %v1247_v0 }
  0x3e   : > { %1110 = vmatpush3.bf16.msra.mxu0 %v1235_v49 }
  0x3f   : > { %1111 = vmatprep.subr.bf16.mxu0 %v1236_v50 }
  0x42   : > { %1112 = vmatpush3.bf16.msra.mxu0 %v1237_v53 }
  0x43   : > { %1113 = vmatprep.subr.bf16.mxu0 %v1238_v54 }
  0x46   : > { %1114 = vmatpush3.bf16.msra.mxu0 %v1239_v55 }
  0x47   : > { %1115 = vmatprep.subr.bf16.mxu0 %v1240_v56 }
  0x4a   : > { %1116 = vmatpush3.bf16.msra.mxu0 %v1241_v57 }
  0x4b   : > { %1117 = vmatprep.subr.bf16.mxu0 %v1242_v58 }
  0x4e   : > { %1118 = vmatpush3.bf16.msra.mxu0 %v1243_v59 }
  0x4f   : > { %1119 = vmatprep.subr.bf16.mxu0 %v1244_v60 }
  0x52   : > { %1120 = vmatpush3.bf16.msra.mxu0 %v1245_v61 }
  0x55   : > { %811 = vmatmul.mubr.bf16.vlgmr.msra.gmra.mxu0 %v1003_v51 }
  0xf5   : > { %v1077_v1 = vpop.f32.mrf.mxu0 }
  0xf7   : > { %v1099_v2 = vpop.f32.mrf.mxu1  ;;  %v1078_v3 = vpop.f32.mrf.mxu0 }
  0xf8   : > { %v1079_v9 = vadd.f32 %v1078_v3, %v1077_v1 }
  0xf9   : > { %v1100_v4 = vpop.f32.mrf.mxu1  ;;  %v1080_v5 = vpop.f32.mrf.mxu0 }
  0xfa   : > { %v733_v11 = vadd.f32 %v1079_v9, %v1002_v10  ;;  %v1101_v12 = vadd.f32 %v1100_v4, %v1099_v2 }
  0xfb   : > { %v1102_v6 = vpop.f32.mrf.mxu1  ;;  %v1081_v7 = vpop.f32.mrf.mxu0 }
  0xfc   : > { %v773_v15 = vadd.f32 %v1101_v12, %v733_v11 }
  0xfd   : > { %v1103_v8 = vpop.f32.mrf.mxu1 }
 0x115   : > { %v1121_v13 = vpop.f32.mrf.mxu0 }
 0x117   : > { %v1122_v14 = vpop.f32.mrf.mxu0 }
 0x118   : > { %v1123_v16 = vadd.f32 %v1122_v14, %v1121_v13 }
 0x119   : > { %v1124_v17 = vpop.f32.mrf.mxu0 }
 0x11a   : > { %v813_v18 = vadd.f32 %v1123_v16, %v773_v15 }
 0x11b   : > { %v1125_v19 = vpop.f32.mrf.mxu0 }
 0x11c   : > { %v818_v20 = vmax.f32 %v813_v18, 0.0 }
 0x11e   : > { %v819_v21 = vpack.c.bf16 %v818_v20, %v818_v20 }
 0x120   : > { %1135 = vmatmul.mubr.msk.bf16.vlgmr.msra.gmra.mxu1 %vm843_vm1, %v819_v21 }
 0x1e0   : > { %v881_v23 = vpop.f32.mrf.mxu1 }
 0x1e1   : > { %v882_v24 = vadd.f32 %v1052_v22, %v881_v23 }
 0x1e2   : > { %v1136_v25 = vpop.f32.mrf.mxu1 }
 0x1e3   : > { %888 = vst.msk [vmem:[%s256_s24] sm:$0xf] %vm887_vm2, %v882_v24 }
 0x1e4   : > { %v884_v26 = vpop.f32.mrf.mxu1 }
 0x1e5   : > { %1261 = shalt.err (!%p1258_p5)
}
 0x1e6   : > { %s1262_s14 = scalar_lea.hbm %s1590_s25, 64  ;;  %s1266_s15 = scalar_lea.hbm %s1641_s5, 128 }
 0x1e7   : > { %p1263_p6 = scmp.ne.s32.totalorder %s1590_s25, %s1262_s14  ;;  %p1267_p10 = scmp.lt.s32.totalorder %s1590_s25, %s1641_s5 }
 0x1e8   : > { %p1268_p11 = scmp.lt.s32.totalorder %s1266_s15, %s1262_s14 }
 0x1e9   : > { %p1264_p7 = pnand %p1263_p6, %p1400_p4 }
 0x1ea   : > { %p1269_p12 = por %p1268_p11, %p1267_p10 }
 0x1eb   : > { %p1265_p9 = pneg %p1264_p7 }
 0x1ed   : > { %p1270_p13 = pnand %p1269_p12, %p1265_p9 }
 0x1ef   : > { %1273 = shalt.err (!%p1270_p13)
}
 0x1f0   : > { %1139 = dma.vmem_to_hbm [thread:$0]  (%p1400_p4), %s1592_s27, 64, %s1590_s25, %s890_s8   ;;  %v1137_v27 = vpop.f32.mrf.mxu1 }
 0x1f1 PF: > { %p1145_p0 = scmp.ge.s32.totalorder %s1324_s23, 2  ;;  %s916_s24 = sand.u32 1, %s1304_s18  }
 0x1f2   : > { %s917_s29 = scalar_lea.sflag [#allocation3], %s916_s24 }
 0x1f3   : > { %p1142_p1 = pnand %p1145_p0, %p1407_p8 }
 0x1f5   : > { %p1143_p2 = pneg %p1142_p1 }
 0x1f7   : > { %1299 = dma.done.wait (%p1143_p2), %s917_s29, 64  }
 0x1f8   : > { %1301 = vsyncadd (%p1143_p2), %s917_s29, 4294967232  ;;  %s18_s23 = sadd.s32 1, %s1324_s23   ;;  %s1644_s18 = smov %s1308_s19 }
 0x1f9   : > { %p15_p3 = scmp.ge.s32.totalorder %s18_s23, 4   ;;  %s1645_s19 = smov %s1312_s20 }
 0x1fa   : > { %s1646_s20 = smov %s1413_s6  ;;  %s1647_s21 = smov %s1320_s22 }
 0x1fb   : > { %s1648_s22 = smov %s1650_s26  ;;  %17 = sbr.rel (!%p15_p3) target bundleno = 4 (0x4), region = 78 }
 0x200   :  { %922 = vsyncpa [#allocation3], 1 }
 0x201   :  { %924 = vsyncpa [#allocation3 + $0x1], 1 }

// kernel: model_exporter_forward.5
= control target key start
LH: loop header
LB: loop body
LE: loop exit
PB: predicated region body
PF: predicated region fallthrough
CT: control target
= control target key end

     0   :  { %10 = vsyncpa [#allocation3], 0  ;;  %s4212_s0 = inlined_call_operand.vmem [shape: bf16[2,1,3072], index: 0, kind: input, shape index: {}]   ;;  %s4213_s1 = inlined_call_operand.vmem [shape: bf16[3072,32], index: 1, kind: input, shape index: {}]   ;;  %s4214_s2 = inlined_call_operand.vmem [shape: f32[1,32], index: 2, kind: input, shape index: {}]   ;;  %s4215_s3 = inlined_call_operand.vmem [shape: bf16[2,32,24], index: 3, kind: input, shape index: {}]   ;;  %s4216_s4 = inlined_call_operand.vmem [shape: f32[1,24], index: 4, kind: input, shape index: {}]   ;;  %s4217_s5 = inlined_call_operand.hbm [shape: f32[2,1,24], index: 5, kind: output, shape index: {}]  }
   0x1   :  { %12 = vsyncpa [#allocation3 + $0x1], 0  ;;  %s3472_s18 = smov 0   ;;  %s3474_s19 = smov 0  }
   0x2   :  { %s3476_s20 = smov 0   ;;  %s3478_s21 = smov 0  }
   0x3   :  { %s3480_s22 = smov 0   ;;  %s3482_s23 = smov 0  }
   0x4 LB: > { %s2623_s24 = sadd.s32 4294967295, %s3436_s23   ;;  %s2624_s25 = sadd.s32 4294967294, %s3436_s23   ;;  %s3436_s23 = sphi %s3482_s23, %s18_s23   ;;  %s3432_s22 = sphi %s3480_s22, %s4224_s22   ;;  %s3428_s21 = sphi %s3478_s21, %s4223_s21   ;;  %s3424_s20 = sphi %s3476_s20, %s4222_s20   ;;  %s3420_s19 = sphi %s3474_s19, %s4221_s19   ;;  %s3416_s18 = sphi %s3472_s18, %s4220_s18  }
   0x5   : > { %s30_s26 = sadd.s32 1, %s3432_s22  ;;  %s156_s27 = sadd.s32 1, %s3424_s20 }
   0x6   : > { %p32_p0 = scmp.ge.s32.totalorder %s30_s26, 2  ;;  %p166_p1 = scmp.ne.s32.totalorder %s3424_s20, %s3420_s19 }
   0x7   : > { %p167_p2 = scmp.eq.s32.totalorder %s2623_s24, 1  ;;  %p172_p3 = scmp.ne.s32.totalorder %s3420_s19, %s3416_s18 }
   0x8   : > { %s4226_s26 = smov (%p32_p0, %s30_s26), 0  ;;  %p173_p5 = scmp.eq.s32.totalorder %s2624_s25, 1 }
   0x9   : > { %p3512_p4 = por %p167_p2, %p166_p1  ;;  %s151_s29 = ssub.s32 %s3432_s22, %s4226_s26 }
   0xa   : > { %p2627_p6 = scmp.ge.s32.totalorder %s3436_s23, 1  ;;  %p154_p7 = scmp.eq.s32.totalorder %s151_s29, 0 }
   0xb   : > { %p3519_p8 = por %p173_p5, %p172_p3  ;;  %p219_p9 = scmp.lt.s32.totalorder %s3436_s23, 3 }
   0xc   : > { %s3525_s6 = scalar_select %p154_p7, %s3424_s20, %s156_s27  }
   0xd   : > { %p220_p10 = pnand %p2627_p6, %p219_p9 }
   0xe   : > { %p254_p11 = scmp.lt.s32.totalorder (!%p220_p10), %s3428_s21, 1  ;;  %s2825_s14 = sshll.u32 (!%p220_p10), %s3428_s21, 4 }
   0xf   : > { %223 = sbr.rel (%p220_p10) target bundleno = 628 (0x274), region = 40  ;;  %s4166_s25 = scalar_lea.hbm (!%p220_p10), %s4217_s5, %s2825_s14 }
  0x10   : > { %s3441_s27 = smov (!%p220_p10), [#allocation2]  }
  0x14   : > { %v3163_v0 = vld [vmem:[%s4213_s1 + $0x78] sm:$0xff]   ;;  %v3167_v4 = vld [vmem:[%s4213_s1 + $0x70] sm:$0xff]   ;;  %v3171_v8 = vld [vmem:[%s4213_s1 + $0x68] sm:$0xff]   ;;  %s3595_s29 = scalar_select %p254_p11, %s3428_s21, 1  ;;  %v663_v28 = vlaneseq  ;;  %v3438_v36 = vmov 1966171168  }
  0x15   : > { %v3164_v1 = vld [vmem:[%s4213_s1 + $0xf8] sm:$0xff]   ;;  %2829 = vmatprep.subr.bf16.mxu0 %v3163_v0  ;;  %v3168_v5 = vld [vmem:[%s4213_s1 + $0xf0] sm:$0xff]   ;;  %v3172_v9 = vld [vmem:[%s4213_s1 + $0xe8] sm:$0xff]   ;;  %v661_v37 = vunpack.c.l.s4 %v3438_v36  ;;  %vm3440_vm0 = vmmov 0   ;;  %vm2481_vm1 = vcmask 261120   ;;  %vm2525_vm2 = vcmask 188416  }
  0x16   : > { %v3165_v2 = vld [vmem:[%s4213_s1 + $0x38] sm:$0xff]   ;;  %2851 = vmatprep.subr.bf16.mxu1 %v3164_v1  ;;  %v3169_v6 = vld [vmem:[%s4213_s1 + $0x30] sm:$0xff]   ;;  %v3173_v10 = vld [vmem:[%s4213_s1 + $0x28] sm:$0xff]   ;;  %s3104_s15 = smul.u32 24, %s3595_s29  ;;  %v664_v33 = vshrl.u32 %v663_v28, 7  ;;  %s2828_s7 = sshll.u32 %s3595_s29, 4 }
  0x17   : > { %v3166_v3 = vld [vmem:[%s4213_s1 + $0xb8] sm:$0xff]   ;;  %2830 = vmatpush3.bf16.msra.mxu0 %v3165_v2  ;;  %v3170_v7 = vld [vmem:[%s4213_s1 + $0xb0] sm:$0xff]   ;;  %v3174_v11 = vld [vmem:[%s4213_s1 + $0xa8] sm:$0xff]   ;;  %v662_v40 = vunpack.c.0.s8 %v661_v37  ;;  %s266_s10 = scalar_lea.vmem %s4215_s3, %s2828_s7  ;;  %s252_s29 = sand.u32 1, %s3420_s19  }
  0x18   : > { %2852 = vmatpush3.bf16.msra.mxu1 %v3166_v3  ;;  %2831 = vmatprep.subr.bf16.mxu0 %v3167_v4  ;;  %v3175_v12 = vld [vmem:[%s4213_s1 + $0x60] sm:$0xff]   ;;  %v3179_v16 = vld [vmem:[%s4213_s1 + $0x58] sm:$0xff]   ;;  %v3183_v20 = vld [vmem:[%s4213_s1 + $0x50] sm:$0xff]   ;;  %s3625_s12 = scalar_lea.vmem %s4212_s0, %s3104_s15  ;;  %s253_s16 = scalar_lea.vmem [#allocation2], %s252_s29 }
  0x19   : > { %2853 = vmatprep.subr.bf16.mxu1 %v3168_v5  ;;  %v3176_v13 = vld [vmem:[%s4213_s1 + $0xe0] sm:$0xff]   ;;  %v3180_v17 = vld [vmem:[%s4213_s1 + $0xd8] sm:$0xff]   ;;  %v3184_v21 = vld [vmem:[%s4213_s1 + $0xd0] sm:$0xff]   ;;  %v3640_v41 = vsub.s32 %v662_v40, %v664_v33  ;;  %s2528_s15 = scalar_lea.sflag [#allocation3], %s252_s29  ;;  %s3364_s7 = sshll.u32 %s3441_s27, 4  ;;  %s3365_s7 = int_to_ptr.vmem [resolvable:$false] %s3364_s7 }
  0x1a   : > { %v3177_v14 = vld [vmem:[%s4213_s1 + $0x20] sm:$0xff]   ;;  %v3181_v18 = vld [vmem:[%s4213_s1 + $0x18] sm:$0xff]   ;;  %v3185_v22 = vld [vmem:[%s4213_s1 + $0x10] sm:$0xff]   ;;  %s3366_s8 = scalar_lea.vmem %s3365_s7, 32 }
  0x1b   : > { %2832 = vmatpush3.bf16.msra.mxu0 %v3169_v6  ;;  %v3178_v15 = vld [vmem:[%s4213_s1 + $0xa0] sm:$0xff]   ;;  %v3182_v19 = vld [vmem:[%s4213_s1 + $0x98] sm:$0xff]   ;;  %v3186_v23 = vld [vmem:[%s4213_s1 + $0x90] sm:$0xff]  }
  0x1c   : > { %2854 = vmatpush3.bf16.msra.mxu1 %v3170_v7  ;;  %2833 = vmatprep.subr.bf16.mxu0 %v3171_v8  ;;  %v3187_v24 = vld [vmem:[%s4213_s1 + $0x48] sm:$0xff]   ;;  %v3191_v29 = vld [vmem:[%s4213_s1 + $0x40] sm:$0xff]   ;;  %v3196_v35 = vld [vmem:[%s4213_s1 + $0x178] sm:$0xff]  }
  0x1d   : > { %2855 = vmatprep.subr.bf16.mxu1 %v3172_v9  ;;  %v3188_v25 = vld [vmem:[%s4213_s1 + $0xc8] sm:$0xff]   ;;  %v3192_v30 = vld [vmem:[%s4213_s1 + $0xc0] sm:$0xff]   ;;  %v3197_v38 = vld [vmem:[%s4213_s1 + $0x1f8] sm:$0xff]  }
  0x1e   : > { %v3189_v26 = vld [vmem:[%s4213_s1 + $0x8] sm:$0xff]   ;;  %v3193_v31 = vld [vmem:[%s4213_s1] sm:$0xff]   ;;  %v3198_v48 = vld [vmem:[%s4213_s1 + $0x138] sm:$0xff]  }
  0x1f   : > { %2834 = vmatpush3.bf16.msra.mxu0 %v3173_v10  ;;  %v3190_v27 = vld [vmem:[%s4213_s1 + $0x88] sm:$0xff]   ;;  %v3194_v32 = vld [vmem:[%s4213_s1 + $0x80] sm:$0xff]   ;;  %v3200_v51 = vld [vmem:[%s4213_s1 + $0x170] sm:$0xff]  }
  0x20   : > { %2856 = vmatpush3.bf16.msra.mxu1 %v3174_v11  ;;  %2835 = vmatprep.subr.bf16.mxu0 %v3175_v12  ;;  %v268_v34 = vld [vmem:[%s3625_s12] sm:$0xff]  ;;  %v3199_v53 = vld [vmem:[%s4213_s1 + $0x1b8] sm:$0xff]   ;;  %v3201_v54 = vld [vmem:[%s4213_s1 + $0x1f0] sm:$0xff]  }
  0x21   : > { %2857 = vmatprep.subr.bf16.mxu1 %v3176_v13  ;;  %v659_v39 = vcombine.high %v268_v34, %v268_v34  ;;  %v666_v42 = vrot.slane %v268_v34, %v3640_v41  ;;  %v3202_v56 = vld [vmem:[%s4213_s1 + $0x130] sm:$0xff]   ;;  %v3204_v57 = vld [vmem:[%s4213_s1 + $0x168] sm:$0xff]   ;;  %v3208_v61 = vld [vmem:[%s4213_s1 + $0x160] sm:$0xff]  }
  0x22   : > { %v3203_v58 = vld [vmem:[%s4213_s1 + $0x1b0] sm:$0xff]   ;;  %v3205_v59 = vld [vmem:[%s4213_s1 + $0x1e8] sm:$0xff]   ;;  %v3209_v63 = vld [vmem:[%s4213_s1 + $0x1e0] sm:$0xff]  }
  0x23   : > { %2836 = vmatpush3.bf16.msra.mxu0 %v3177_v14  ;;  %v3644_v43 = vrot.slane %v659_v39, %v3640_v41  ;;  %v674_v44 = vcombine.high %v666_v42, %v666_v42  ;;  %v682_v45 = vrot.slane %v666_v42, %v3640_v41  ;;  %v3206_v60 = vld [vmem:[%s4213_s1 + $0x128] sm:$0xff]   ;;  %v3210_v0 = vld [vmem:[%s4213_s1 + $0x120] sm:$0xff]   ;;  %v3212_v1 = vld [vmem:[%s4213_s1 + $0x158] sm:$0xff]  }
  0x24   : > { %2858 = vmatpush3.bf16.msra.mxu1 %v3178_v15  ;;  %2837 = vmatprep.subr.bf16.mxu0 %v3179_v16  ;;  %v3207_v62 = vld [vmem:[%s4213_s1 + $0x1a8] sm:$0xff]   ;;  %v3211_v2 = vld [vmem:[%s4213_s1 + $0x1a0] sm:$0xff]   ;;  %v3213_v3 = vld [vmem:[%s4213_s1 + $0x1d8] sm:$0xff]  }
  0x25   : > { %2859 = vmatprep.subr.bf16.mxu1 %v3180_v17  ;;  %v675_v46 = vcombine.high %v3644_v43, %v3644_v43  ;;  %v696_v47 = vrot.slane %v674_v44, %v3640_v41  ;;  %v704_v50 = vcombine.high %v682_v45, %v682_v45  ;;  %v3214_v4 = vld [vmem:[%s4213_s1 + $0x118] sm:$0xff]   ;;  %v3216_v5 = vld [vmem:[%s4213_s1 + $0x150] sm:$0xff]   ;;  %v3220_v9 = vld [vmem:[%s4213_s1 + $0x148] sm:$0xff]   ;;  %v689_v17 = vrot.slane %v3644_v43, %v3640_v41 }
  0x26   : > { %v3215_v6 = vld [vmem:[%s4213_s1 + $0x198] sm:$0xff]   ;;  %v3217_v7 = vld [vmem:[%s4213_s1 + $0x1d0] sm:$0xff]   ;;  %v3221_v11 = vld [vmem:[%s4213_s1 + $0x1c8] sm:$0xff]  }
  0x27   : > { %2838 = vmatpush3.bf16.msra.mxu0 %v3181_v18  ;;  %v703_v49 = vrot.slane %v675_v46, %v3640_v41  ;;  %2014 = vmatprep.mubr.bf16.mxu0 %v696_v47  ;;  %v706_v52 = vcombine.high %v696_v47, %v696_v47  ;;  %v3218_v8 = vld [vmem:[%s4213_s1 + $0x110] sm:$0xff]   ;;  %v3222_v12 = vld [vmem:[%s4213_s1 + $0x108] sm:$0xff]   ;;  %v3224_v13 = vld [vmem:[%s4213_s1 + $0x140] sm:$0xff]  }
  0x28   : > { %2860 = vmatpush3.bf16.msra.mxu1 %v3182_v19  ;;  %2839 = vmatprep.subr.bf16.mxu0 %v3183_v20  ;;  %v3219_v10 = vld [vmem:[%s4213_s1 + $0x190] sm:$0xff]   ;;  %v3223_v14 = vld [vmem:[%s4213_s1 + $0x188] sm:$0xff]   ;;  %v3225_v15 = vld [vmem:[%s4213_s1 + $0x1c0] sm:$0xff]  }
  0x29   : > { %2861 = vmatprep.subr.bf16.mxu1 %v3184_v21  ;;  %v707_v55 = vcombine.high %v703_v49, %v703_v49  ;;  %2054 = vmatprep.mubr.bf16.mxu1 %v706_v52  ;;  %v3226_v16 = vld [vmem:[%s4213_s1 + $0x100] sm:$0xff]   ;;  %v3228_v18 = vld [vmem:[%s4213_s1 + $0x278] sm:$0xff]   ;;  %v3235_v28 = vld [vmem:[%s4213_s1 + $0x2b0] sm:$0xff]  }
  0x2a   : > { %v3227_v19 = vld [vmem:[%s4213_s1 + $0x180] sm:$0xff]   ;;  %v3229_v20 = vld [vmem:[%s4213_s1 + $0x2f8] sm:$0xff]   ;;  %v3248_v39 = vld [vmem:[%s4213_s1 + $0x250] sm:$0xff]  }
  0x2b   : > { %2840 = vmatpush3.bf16.msra.mxu0 %v3185_v22  ;;  %v3230_v21 = vld [vmem:[%s4213_s1 + $0x238] sm:$0xff]   ;;  %v705_v22 = vcombine.high %v689_v17, %v689_v17  ;;  %v3241_v33 = vld [vmem:[%s4213_s1 + $0x2e0] sm:$0xff]   ;;  %v3249_v42 = vld [vmem:[%s4213_s1 + $0x2d0] sm:$0xff]  }
  0x2c   : > { %2862 = vmatpush3.bf16.msra.mxu1 %v3186_v23  ;;  %2841 = vmatprep.subr.bf16.mxu0 %v3187_v24  ;;  %v3232_v23 = vld [vmem:[%s4213_s1 + $0x270] sm:$0xff]   ;;  %v3231_v24 = vld [vmem:[%s4213_s1 + $0x2b8] sm:$0xff]   ;;  %v3242_v34 = vld [vmem:[%s4213_s1 + $0x220] sm:$0xff]  }
  0x2d   : > { %2863 = vmatprep.subr.bf16.mxu1 %v3188_v25  ;;  %v3233_v25 = vld [vmem:[%s4213_s1 + $0x2f0] sm:$0xff]   ;;  %v3243_v36 = vld [vmem:[%s4213_s1 + $0x2a0] sm:$0xff]   ;;  %v3245_v37 = vld [vmem:[%s4213_s1 + $0x2d8] sm:$0xff]  }
  0x2e   : > { %v3247_v40 = vld [vmem:[%s4213_s1 + $0x298] sm:$0xff]   ;;  %v3250_v43 = vld [vmem:[%s4213_s1 + $0x210] sm:$0xff]   ;;  %v3252_v44 = vld [vmem:[%s4213_s1 + $0x248] sm:$0xff]  }
  0x2f   : > { %2842 = vmatpush3.bf16.msra.mxu0 %v3189_v26  ;;  %v3234_v26 = vld [vmem:[%s4213_s1 + $0x230] sm:$0xff]  }
  0x30   : > { %2864 = vmatpush3.bf16.msra.mxu1 %v3190_v27  ;;  %2843 = vmatprep.subr.bf16.mxu0 %v3191_v29  ;;  %v3236_v27 = vld [vmem:[%s4213_s1 + $0x268] sm:$0xff]   ;;  %v3251_v46 = vld [vmem:[%s4213_s1 + $0x290] sm:$0xff]  }
  0x31   : > { %2865 = vmatprep.subr.bf16.mxu1 %v3192_v30  ;;  %v3237_v29 = vld [vmem:[%s4213_s1 + $0x2e8] sm:$0xff]  }
  0x32   : > { %v3238_v30 = vld [vmem:[%s4213_s1 + $0x228] sm:$0xff]  }
  0x33   : > { %2844 = vmatpush3.bf16.msra.mxu0 %v3193_v31  ;;  %v3240_v31 = vld [vmem:[%s4213_s1 + $0x260] sm:$0xff]  }
  0x34   : > { %2866 = vmatpush3.bf16.msra.mxu1 %v3194_v32  ;;  %2873 = vmatprep.subr.bf16.mxu0 %v3196_v35  ;;  %v3239_v32 = vld [vmem:[%s4213_s1 + $0x2a8] sm:$0xff]   ;;  %v3244_v35 = vld [vmem:[%s4213_s1 + $0x258] sm:$0xff]  }
  0x35   : > { %2895 = vmatprep.subr.bf16.mxu1 %v3197_v38  ;;  %v3246_v38 = vld [vmem:[%s4213_s1 + $0x218] sm:$0xff]  }
  0x36   : > { %2015 = vmatmul.mubr.bf16.vlgmr.msra.gmra.mxu0 %v682_v45  ;;  %v269_v45 = vld [vmem:[%s3625_s12 + $0x8] sm:$0xff] }
  0x37   : > { %2874 = vmatpush3.bf16.msra.mxu0 %v3198_v48  ;;  %2055 = vmatmul.mubr.bf16.vlgmr.msra.gmra.mxu1 %v704_v50  ;;  %v715_v47 = vrot.slane %v269_v45, %v3640_v41  ;;  %v708_v48 = vcombine.high %v269_v45, %v269_v45  ;;  %v3254_v50 = vld [vmem:[%s4213_s1 + $0x208] sm:$0xff]  }
  0x38   : > { %2875 = vmatprep.subr.bf16.mxu0 %v3200_v51  ;;  %2896 = vmatpush3.bf16.msra.mxu1 %v3199_v53  ;;  %v3256_v53 = vld [vmem:[%s4213_s1 + $0x240] sm:$0xff]   ;;  %v3302_v45 = vld [vmem:[%s4213_s1 + $0x4e8] sm:$0xff]  }
  0x39   : > { %2094 = vmatprep.mubr.bf16.mxu0 %v703_v49  ;;  %2897 = vmatprep.subr.bf16.mxu1 %v3201_v54  ;;  %v3253_v49 = vld [vmem:[%s4213_s1 + $0x2c8] sm:$0xff]   ;;  %v723_v51 = vcombine.high %v715_v47, %v715_v47  ;;  %v3827_v52 = vrot.slane %v708_v48, %v3640_v41 }
  0x3a   : > { %2134 = vmatprep.mubr.bf16.mxu1 %v707_v55  ;;  %v3255_v54 = vld [vmem:[%s4213_s1 + $0x288] sm:$0xff]  }
  0x3b   : > { %2876 = vmatpush3.bf16.msra.mxu0 %v3202_v56  ;;  %v745_v55 = vrot.slane %v723_v51, %v3640_v41  ;;  %v724_v56 = vcombine.high %v3827_v52, %v3827_v52  ;;  %v3304_v48 = vld [vmem:[%s4213_s1 + $0x4a8] sm:$0xff]   ;;  %v3309_v51 = vld [vmem:[%s4213_s1 + $0x458] sm:$0xff]  }
  0x3c   : > { %2877 = vmatprep.subr.bf16.mxu0 %v3204_v57  ;;  %2898 = vmatpush3.bf16.msra.mxu1 %v3203_v58  ;;  %v3257_v57 = vld [vmem:[%s4213_s1 + $0x2c0] sm:$0xff]  }
  0x3d   : > { %2899 = vmatprep.subr.bf16.mxu1 %v3205_v59  ;;  %v3258_v58 = vld [vmem:[%s4213_s1 + $0x200] sm:$0xff]   ;;  %v755_v59 = vcombine.high %v745_v55, %v745_v55 }
  0x3f   : > { %2878 = vmatpush3.bf16.msra.mxu0 %v3206_v60  ;;  %v731_v60 = vrot.slane %v715_v47, %v3640_v41  ;;  %v3305_v47 = vld [vmem:[%s4213_s1 + $0x460] sm:$0xff]  }
  0x40   : > { %2879 = vmatprep.subr.bf16.mxu0 %v3208_v61  ;;  %2900 = vmatpush3.bf16.msra.mxu1 %v3207_v62  ;;  %v3260_v61 = vld [vmem:[%s4213_s1 + $0x378] sm:$0xff]   ;;  %v3259_v62 = vld [vmem:[%s4213_s1 + $0x280] sm:$0xff]  }
  0x41   : > { %2901 = vmatprep.subr.bf16.mxu1 %v3209_v63  ;;  %v752_v63 = vrot.slane %v724_v56, %v3640_v41  ;;  %v3312_v56 = vld [vmem:[%s4213_s1 + $0x498] sm:$0xff]  }
  0x43   : > { %2880 = vmatpush3.bf16.msra.mxu0 %v3210_v0  ;;  %v3261_v0 = vld [vmem:[%s4213_s1 + $0x3f8] sm:$0xff]  }
  0x44   : > { %2881 = vmatprep.subr.bf16.mxu0 %v3212_v1  ;;  %2902 = vmatpush3.bf16.msra.mxu1 %v3211_v2  ;;  %v3262_v1 = vld [vmem:[%s4213_s1 + $0x338] sm:$0xff]   ;;  %v753_v2 = vcombine.high %v731_v60, %v731_v60 }
  0x45   : > { %2903 = vmatprep.subr.bf16.mxu1 %v3213_v3  ;;  %v3264_v3 = vld [vmem:[%s4213_s1 + $0x370] sm:$0xff]  }
  0x47   : > { %2882 = vmatpush3.bf16.msra.mxu0 %v3214_v4  ;;  %v3263_v4 = vld [vmem:[%s4213_s1 + $0x3b8] sm:$0xff]  }
  0x48   : > { %2883 = vmatprep.subr.bf16.mxu0 %v3216_v5  ;;  %2904 = vmatpush3.bf16.msra.mxu1 %v3215_v6  ;;  %v756_v5 = vcombine.high %v752_v63, %v752_v63  ;;  %v3265_v6 = vld [vmem:[%s4213_s1 + $0x3f0] sm:$0xff]  }
  0x49   : > { %2905 = vmatprep.subr.bf16.mxu1 %v3217_v7  ;;  %v3266_v7 = vld [vmem:[%s4213_s1 + $0x330] sm:$0xff]  }
  0x4b   : > { %2884 = vmatpush3.bf16.msra.mxu0 %v3218_v8  ;;  %v3268_v8 = vld [vmem:[%s4213_s1 + $0x368] sm:$0xff]  }
  0x4c   : > { %2885 = vmatprep.subr.bf16.mxu0 %v3220_v9  ;;  %2906 = vmatpush3.bf16.msra.mxu1 %v3219_v10  ;;  %v3267_v9 = vld [vmem:[%s4213_s1 + $0x3b0] sm:$0xff]   ;;  %v3269_v10 = vld [vmem:[%s4213_s1 + $0x3e8] sm:$0xff]  }
  0x4d   : > { %2907 = vmatprep.subr.bf16.mxu1 %v3221_v11  ;;  %v3270_v11 = vld [vmem:[%s4213_s1 + $0x328] sm:$0xff]  }
  0x4f   : > { %2886 = vmatpush3.bf16.msra.mxu0 %v3222_v12  ;;  %v3272_v12 = vld [vmem:[%s4213_s1 + $0x360] sm:$0xff]  }
  0x50   : > { %2887 = vmatprep.subr.bf16.mxu0 %v3224_v13  ;;  %2908 = vmatpush3.bf16.msra.mxu1 %v3223_v14  ;;  %v3271_v13 = vld [vmem:[%s4213_s1 + $0x3a8] sm:$0xff]   ;;  %v3273_v14 = vld [vmem:[%s4213_s1 + $0x3e0] sm:$0xff]  }
  0x51   : > { %2909 = vmatprep.subr.bf16.mxu1 %v3225_v15  ;;  %v3274_v15 = vld [vmem:[%s4213_s1 + $0x320] sm:$0xff]  }
  0x53   : > { %2888 = vmatpush3.bf16.msra.mxu0 %v3226_v16  ;;  %v3276_v16 = vld [vmem:[%s4213_s1 + $0x358] sm:$0xff]  }
  0x54   : > { %2917 = vmatprep.subr.bf16.mxu0 %v3228_v18  ;;  %2910 = vmatpush3.bf16.msra.mxu1 %v3227_v19  ;;  %v3277_v18 = vld [vmem:[%s4213_s1 + $0x3d8] sm:$0xff]  }
  0x55   : > { %2939 = vmatprep.subr.bf16.mxu1 %v3229_v20  ;;  %v3278_v19 = vld [vmem:[%s4213_s1 + $0x318] sm:$0xff]   ;;  %v3280_v20 = vld [vmem:[%s4213_s1 + $0x350] sm:$0xff]  }
  0x56   : > { %2095 = vmatmul.mubr.bf16.vlgmr.msra.gmra.mxu0 %v689_v17  ;;  %v3275_v17 = vld [vmem:[%s4213_s1 + $0x3a0] sm:$0xff]  }
  0x57   : > { %2918 = vmatpush3.bf16.msra.mxu0 %v3230_v21  ;;  %2135 = vmatmul.mubr.bf16.vlgmr.msra.gmra.mxu1 %v705_v22  ;;  %v3279_v21 = vld [vmem:[%s4213_s1 + $0x398] sm:$0xff]   ;;  %v3281_v22 = vld [vmem:[%s4213_s1 + $0x3d0] sm:$0xff]  }
  0x58   : > { %2919 = vmatprep.subr.bf16.mxu0 %v3232_v23  ;;  %2940 = vmatpush3.bf16.msra.mxu1 %v3231_v24  ;;  %v3282_v23 = vld [vmem:[%s4213_s1 + $0x310] sm:$0xff]   ;;  %v3284_v24 = vld [vmem:[%s4213_s1 + $0x348] sm:$0xff]  }
  0x59   : > { %2941 = vmatprep.subr.bf16.mxu1 %v3233_v25  ;;  %2174 = vmatprep.mubr.bf16.mxu0 %v745_v55  ;;  %v3283_v25 = vld [vmem:[%s4213_s1 + $0x390] sm:$0xff]  }
  0x5a   : > { %2214 = vmatprep.mubr.bf16.mxu1 %v755_v59  ;;  %v3313_v55 = vld [vmem:[%s4213_s1 + $0x450] sm:$0xff]   ;;  %v3317_v59 = vld [vmem:[%s4213_s1 + $0x448] sm:$0xff]  }
  0x5b   : > { %2920 = vmatpush3.bf16.msra.mxu0 %v3234_v26  ;;  %v3285_v26 = vld [vmem:[%s4213_s1 + $0x3c8] sm:$0xff]  }
  0x5c   : > { %2921 = vmatprep.subr.bf16.mxu0 %v3236_v27  ;;  %2942 = vmatpush3.bf16.msra.mxu1 %v3235_v28  ;;  %v3286_v27 = vld [vmem:[%s4213_s1 + $0x308] sm:$0xff]   ;;  %v3288_v28 = vld [vmem:[%s4213_s1 + $0x340] sm:$0xff]  }
  0x5d   : > { %2943 = vmatprep.subr.bf16.mxu1 %v3237_v29  ;;  %v3287_v29 = vld [vmem:[%s4213_s1 + $0x388] sm:$0xff]  }
  0x5f   : > { %2922 = vmatpush3.bf16.msra.mxu0 %v3238_v30  ;;  %v3289_v30 = vld [vmem:[%s4213_s1 + $0x3c0] sm:$0xff]  }
  0x60   : > { %2923 = vmatprep.subr.bf16.mxu0 %v3240_v31  ;;  %2944 = vmatpush3.bf16.msra.mxu1 %v3239_v32  ;;  %v3290_v31 = vld [vmem:[%s4213_s1 + $0x300] sm:$0xff]   ;;  %v738_v32 = vrot.slane %v3827_v52, %v3640_v41 }
  0x61   : > { %2945 = vmatprep.subr.bf16.mxu1 %v3241_v33  ;;  %v3293_v33 = vld [vmem:[%s4213_s1 + $0x478] sm:$0xff]   ;;  %v3308_v52 = vld [vmem:[%s4213_s1 + $0x4a0] sm:$0xff]  }
  0x63   : > { %2924 = vmatpush3.bf16.msra.mxu0 %v3242_v34  ;;  %v3291_v34 = vld [vmem:[%s4213_s1 + $0x380] sm:$0xff]  }
  0x64   : > { %2925 = vmatprep.subr.bf16.mxu0 %v3244_v35  ;;  %2946 = vmatpush3.bf16.msra.mxu1 %v3243_v36  ;;  %v3294_v35 = vld [vmem:[%s4213_s1 + $0x4f8] sm:$0xff]  }
  0x65   : > { %2947 = vmatprep.subr.bf16.mxu1 %v3245_v37  ;;  %v3295_v36 = vld [vmem:[%s4213_s1 + $0x438] sm:$0xff]   ;;  %v754_v37 = vcombine.high %v738_v32, %v738_v32 }
  0x67   : > { %2926 = vmatpush3.bf16.msra.mxu0 %v3246_v38  ;;  %v3297_v38 = vld [vmem:[%s4213_s1 + $0x470] sm:$0xff]  }
  0x68   : > { %2927 = vmatprep.subr.bf16.mxu0 %v3248_v39  ;;  %2948 = vmatpush3.bf16.msra.mxu1 %v3247_v40  ;;  %v3296_v39 = vld [vmem:[%s4213_s1 + $0x4b8] sm:$0xff]   ;;  %v3298_v40 = vld [vmem:[%s4213_s1 + $0x4f0] sm:$0xff]  }
  0x69   : > { %2949 = vmatprep.subr.bf16.mxu1 %v3249_v42  ;;  %v3299_v42 = vld [vmem:[%s4213_s1 + $0x430] sm:$0xff]  }
  0x6b   : > { %2928 = vmatpush3.bf16.msra.mxu0 %v3250_v43  ;;  %v3301_v43 = vld [vmem:[%s4213_s1 + $0x468] sm:$0xff]  }
  0x6c   : > { %2929 = vmatprep.subr.bf16.mxu0 %v3252_v44  ;;  %2950 = vmatpush3.bf16.msra.mxu1 %v3251_v46  ;;  %v3300_v44 = vld [vmem:[%s4213_s1 + $0x4b0] sm:$0xff]   ;;  %v3303_v46 = vld [vmem:[%s4213_s1 + $0x428] sm:$0xff]  }
  0x6d   : > { %2951 = vmatprep.subr.bf16.mxu1 %v3253_v49  ;;  %v3306_v49 = vld [vmem:[%s4213_s1 + $0x4e0] sm:$0xff]  }
  0x6f   : > { %2930 = vmatpush3.bf16.msra.mxu0 %v3254_v50  ;;  %v3307_v50 = vld [vmem:[%s4213_s1 + $0x420] sm:$0xff]  }
  0x70   : > { %2931 = vmatprep.subr.bf16.mxu0 %v3256_v53  ;;  %2952 = vmatpush3.bf16.msra.mxu1 %v3255_v54  ;;  %v3310_v53 = vld [vmem:[%s4213_s1 + $0x4d8] sm:$0xff]  }
  0x71   : > { %2953 = vmatprep.subr.bf16.mxu1 %v3257_v57  ;;  %v3311_v54 = vld [vmem:[%s4213_s1 + $0x418] sm:$0xff]   ;;  %v3314_v57 = vld [vmem:[%s4213_s1 + $0x4d0] sm:$0xff]  }
  0x73   : > { %2932 = vmatpush3.bf16.msra.mxu0 %v3258_v58  ;;  %v3315_v58 = vld [vmem:[%s4213_s1 + $0x410] sm:$0xff]  }
  0x74   : > { %2961 = vmatprep.subr.bf16.mxu0 %v3260_v61  ;;  %2954 = vmatpush3.bf16.msra.mxu1 %v3259_v62  ;;  %v3316_v61 = vld [vmem:[%s4213_s1 + $0x490] sm:$0xff]  }
  0x75   : > { %2983 = vmatprep.subr.bf16.mxu1 %v3261_v0  ;;  %v3318_v0 = vld [vmem:[%s4213_s1 + $0x4c8] sm:$0xff]  }
  0x76   : > { %2175 = vmatmul.mubr.bf16.vlgmr.msra.gmra.mxu0 %v731_v60  ;;  %v270_v60 = vld [vmem:[%s3625_s12 + $0x10] sm:$0xff]  ;;  %s2541_s12 = sshll.u32 %s253_s16, 4  ;;  %s4168_s12 = int_to_ptr.vmem [resolvable:$true] %s2541_s12 }
  0x77   : > { %2962 = vmatpush3.bf16.msra.mxu0 %v3262_v1  ;;  %2254 = vmatprep.mubr.bf16.mxu0 %v752_v63  ;;  %v764_v62 = vrot.slane %v270_v60, %v3640_v41  ;;  %v757_v63 = vcombine.high %v270_v60, %v270_v60  ;;  %v3319_v1 = vld [vmem:[%s4213_s1 + $0x408] sm:$0xff]   ;;  %s3360_s21 = scalar_lea.vmem %s4168_s12, 16  ;;  %p3367_p1 = scmp.lt.s32.totalorder %s4168_s12, %s3365_s7 }
  0x78   : > { %2215 = vmatmul.mubr.bf16.vlgmr.msra.gmra.mxu1 %v753_v2  ;;  %2963 = vmatprep.subr.bf16.mxu0 %v3264_v3  ;;  %p3361_p12 = scmp.ne.s32.totalorder %s4168_s12, %s3360_s21  ;;  %p3368_p2 = scmp.lt.s32.totalorder %s3366_s8, %s3360_s21 }
  0x79   : > { %2984 = vmatpush3.bf16.msra.mxu1 %v3263_v4  ;;  %2294 = vmatprep.mubr.bf16.mxu1 %v756_v5  ;;  %v772_v2 = vcombine.high %v764_v62, %v764_v62  ;;  %v4031_v3 = vrot.slane %v757_v63, %v3640_v41  ;;  %v3321_v4 = vld [vmem:[%s4213_s1 + $0x440] sm:$0xff]   ;;  %v3320_v5 = vld [vmem:[%s4213_s1 + $0x488] sm:$0xff]  }
  0x7a   : > { %2985 = vmatprep.subr.bf16.mxu1 %v3265_v6  ;;  %p3362_p13 = pnand %p3361_p12, %p3512_p4  ;;  %p3369_p3 = por %p3368_p2, %p3367_p1 }
  0x7b   : > { %2964 = vmatpush3.bf16.msra.mxu0 %v3266_v7  ;;  %v794_v6 = vrot.slane %v772_v2, %v3640_v41  ;;  %v773_v7 = vcombine.high %v4031_v3, %v4031_v3 }
  0x7c   : > { %2965 = vmatprep.subr.bf16.mxu0 %v3268_v8  ;;  %v3322_v8 = vld [vmem:[%s4213_s1 + $0x4c0] sm:$0xff]   ;;  %p3363_p0 = pneg %p3362_p13 }
  0x7d   : > { %2986 = vmatpush3.bf16.msra.mxu1 %v3267_v9  ;;  %v3323_v9 = vld [vmem:[%s4213_s1 + $0x400] sm:$0xff]  }
  0x7e   : > { %2987 = vmatprep.subr.bf16.mxu1 %v3269_v10  ;;  %v804_v10 = vcombine.high %v794_v6, %v794_v6  ;;  %p3370_p5 = pnand %p3369_p3, %p3363_p0 }
  0x7f   : > { %2966 = vmatpush3.bf16.msra.mxu0 %v3270_v11  ;;  %v780_v11 = vrot.slane %v764_v62, %v3640_v41 }
  0x80   : > { %2967 = vmatprep.subr.bf16.mxu0 %v3272_v12  ;;  %v3325_v12 = vld [vmem:[%s4213_s1 + $0x578] sm:$0xff]  }
  0x81   : > { %2988 = vmatpush3.bf16.msra.mxu1 %v3271_v13  ;;  %v3324_v13 = vld [vmem:[%s4213_s1 + $0x480] sm:$0xff]  }
  0x82   : > { %2989 = vmatprep.subr.bf16.mxu1 %v3273_v14  ;;  %v801_v14 = vrot.slane %v773_v7, %v3640_v41 }
  0x83   : > { %2968 = vmatpush3.bf16.msra.mxu0 %v3274_v15  ;;  %v3326_v15 = vld [vmem:[%s4213_s1 + $0x5f8] sm:$0xff]  }
  0x84   : > { %2969 = vmatprep.subr.bf16.mxu0 %v3276_v16  ;;  %v3327_v16 = vld [vmem:[%s4213_s1 + $0x538] sm:$0xff]  }
  0x85   : > { %2990 = vmatpush3.bf16.msra.mxu1 %v3275_v17  ;;  %v802_v17 = vcombine.high %v780_v11, %v780_v11 }
  0x86   : > { %2991 = vmatprep.subr.bf16.mxu1 %v3277_v18  ;;  %v3329_v18 = vld [vmem:[%s4213_s1 + $0x570] sm:$0xff]  }
  0x87   : > { %2970 = vmatpush3.bf16.msra.mxu0 %v3278_v19  ;;  %v3328_v19 = vld [vmem:[%s4213_s1 + $0x5b8] sm:$0xff]  }
  0x88   : > { %2971 = vmatprep.subr.bf16.mxu0 %v3280_v20  ;;  %v805_v20 = vcombine.high %v801_v14, %v801_v14 }
  0x89   : > { %2992 = vmatpush3.bf16.msra.mxu1 %v3279_v21  ;;  %v3330_v21 = vld [vmem:[%s4213_s1 + $0x5f0] sm:$0xff]  }
  0x8a   : > { %2993 = vmatprep.subr.bf16.mxu1 %v3281_v22  ;;  %v3331_v22 = vld [vmem:[%s4213_s1 + $0x530] sm:$0xff]  }
  0x8b   : > { %2972 = vmatpush3.bf16.msra.mxu0 %v3282_v23  ;;  %v3333_v23 = vld [vmem:[%s4213_s1 + $0x568] sm:$0xff]  }
  0x8c   : > { %2973 = vmatprep.subr.bf16.mxu0 %v3284_v24  ;;  %v3332_v24 = vld [vmem:[%s4213_s1 + $0x5b0] sm:$0xff]  }
  0x8d   : > { %2994 = vmatpush3.bf16.msra.mxu1 %v3283_v25  ;;  %v3334_v25 = vld [vmem:[%s4213_s1 + $0x5e8] sm:$0xff]  }
  0x8e   : > { %2995 = vmatprep.subr.bf16.mxu1 %v3285_v26  ;;  %v3335_v26 = vld [vmem:[%s4213_s1 + $0x528] sm:$0xff]  }
  0x8f   : > { %2974 = vmatpush3.bf16.msra.mxu0 %v3286_v27  ;;  %v3337_v27 = vld [vmem:[%s4213_s1 + $0x560] sm:$0xff]  }
  0x90   : > { %2975 = vmatprep.subr.bf16.mxu0 %v3288_v28  ;;  %v3336_v28 = vld [vmem:[%s4213_s1 + $0x5a8] sm:$0xff]  }
  0x91   : > { %2996 = vmatpush3.bf16.msra.mxu1 %v3287_v29  ;;  %v3338_v29 = vld [vmem:[%s4213_s1 + $0x5e0] sm:$0xff]  }
  0x92   : > { %2997 = vmatprep.subr.bf16.mxu1 %v3289_v30  ;;  %v3339_v30 = vld [vmem:[%s4213_s1 + $0x520] sm:$0xff]  }
  0x93   : > { %2976 = vmatpush3.bf16.msra.mxu0 %v3290_v31  ;;  %v3341_v31 = vld [vmem:[%s4213_s1 + $0x558] sm:$0xff]  }
  0x94   : > { %3005 = vmatprep.subr.bf16.mxu0 %v3293_v33  ;;  %v3342_v33 = vld [vmem:[%s4213_s1 + $0x5d8] sm:$0xff]  }
  0x95   : > { %2998 = vmatpush3.bf16.msra.mxu1 %v3291_v34  ;;  %v3343_v34 = vld [vmem:[%s4213_s1 + $0x518] sm:$0xff]  }
  0x96   : > { %2255 = vmatmul.mubr.bf16.vlgmr.msra.gmra.mxu0 %v738_v32  ;;  %3027 = vmatprep.subr.bf16.mxu1 %v3294_v35  ;;  %v3340_v32 = vld [vmem:[%s4213_s1 + $0x5a0] sm:$0xff]   ;;  %v3345_v35 = vld [vmem:[%s4213_s1 + $0x550] sm:$0xff]  }
  0x97   : > { %3006 = vmatpush3.bf16.msra.mxu0 %v3295_v36  ;;  %2334 = vmatprep.mubr.bf16.mxu0 %v794_v6  ;;  %v3344_v36 = vld [vmem:[%s4213_s1 + $0x598] sm:$0xff]  }
  0x98   : > { %2295 = vmatmul.mubr.bf16.vlgmr.msra.gmra.mxu1 %v754_v37  ;;  %3007 = vmatprep.subr.bf16.mxu0 %v3297_v38  ;;  %v3346_v37 = vld [vmem:[%s4213_s1 + $0x5d0] sm:$0xff]  }
  0x99   : > { %3028 = vmatpush3.bf16.msra.mxu1 %v3296_v39  ;;  %2374 = vmatprep.mubr.bf16.mxu1 %v804_v10  ;;  %v3347_v38 = vld [vmem:[%s4213_s1 + $0x510] sm:$0xff]   ;;  %v3349_v39 = vld [vmem:[%s4213_s1 + $0x548] sm:$0xff]  }
  0x9a   : > { %3029 = vmatprep.subr.bf16.mxu1 %v3298_v40  ;;  %v3348_v40 = vld [vmem:[%s4213_s1 + $0x590] sm:$0xff]  }
  0x9b   : > { %3008 = vmatpush3.bf16.msra.mxu0 %v3299_v42  ;;  %v3350_v42 = vld [vmem:[%s4213_s1 + $0x5c8] sm:$0xff]  }
  0x9c   : > { %3009 = vmatprep.subr.bf16.mxu0 %v3301_v43  ;;  %v3351_v43 = vld [vmem:[%s4213_s1 + $0x508] sm:$0xff]  }
  0x9d   : > { %3030 = vmatpush3.bf16.msra.mxu1 %v3300_v44  ;;  %v3353_v44 = vld [vmem:[%s4213_s1 + $0x540] sm:$0xff]  }
  0x9e   : > { %3031 = vmatprep.subr.bf16.mxu1 %v3302_v45  ;;  %v3352_v45 = vld [vmem:[%s4213_s1 + $0x588] sm:$0xff]  }
  0x9f   : > { %3010 = vmatpush3.bf16.msra.mxu0 %v3303_v46  ;;  %v3354_v46 = vld [vmem:[%s4213_s1 + $0x5c0] sm:$0xff]  }
  0xa0   : > { %3011 = vmatprep.subr.bf16.mxu0 %v3305_v47  ;;  %v3355_v47 = vld [vmem:[%s4213_s1 + $0x500] sm:$0xff]  }
  0xa1   : > { %3032 = vmatpush3.bf16.msra.mxu1 %v3304_v48  ;;  %v787_v48 = vrot.slane %v4031_v3, %v3640_v41 }
  0xa2   : > { %3033 = vmatprep.subr.bf16.mxu1 %v3306_v49  ;;  %v3356_v49 = vld [vmem:[%s4213_s1 + $0x580] sm:$0xff]  }
  0xa3   : > { %3012 = vmatpush3.bf16.msra.mxu0 %v3307_v50  ;;  %v803_v50 = vcombine.high %v787_v48, %v787_v48 }
  0xa4   : > { %3013 = vmatprep.subr.bf16.mxu0 %v3309_v51 }
  0xa5   : > { %3034 = vmatpush3.bf16.msra.mxu1 %v3308_v52 }
  0xa6   : > { %3035 = vmatprep.subr.bf16.mxu1 %v3310_v53  ;;  %v655_v53 = vld [vmem:[%s4214_s2] sm:$0x1] }
  0xa7   : > { %3014 = vmatpush3.bf16.msra.mxu0 %v3311_v54 }
  0xa8   : > { %3015 = vmatprep.subr.bf16.mxu0 %v3313_v55 }
  0xa9   : > { %3036 = vmatpush3.bf16.msra.mxu1 %v3312_v56 }
  0xaa   : > { %3037 = vmatprep.subr.bf16.mxu1 %v3314_v57 }
  0xab   : > { %3016 = vmatpush3.bf16.msra.mxu0 %v3315_v58 }
  0xac   : > { %3017 = vmatprep.subr.bf16.mxu0 %v3317_v59 }
  0xad   : > { %3038 = vmatpush3.bf16.msra.mxu1 %v3316_v61 }
  0xae   : > { %3039 = vmatprep.subr.bf16.mxu1 %v3318_v0 }
  0xaf   : > { %3018 = vmatpush3.bf16.msra.mxu0 %v3319_v1 }
  0xb0   : > { %3019 = vmatprep.subr.bf16.mxu0 %v3321_v4 }
  0xb1   : > { %3040 = vmatpush3.bf16.msra.mxu1 %v3320_v5 }
  0xb2   : > { %3041 = vmatprep.subr.bf16.mxu1 %v3322_v8 }
  0xb3   : > { %3020 = vmatpush3.bf16.msra.mxu0 %v3323_v9  ;;  %v3358_v9 = vld [vmem:[%s266_s10 + $0x8] sm:$0xff]  }
  0xb4   : > { %3049 = vmatprep.subr.bf16.mxu0 %v3325_v12 }
  0xb5   : > { %3042 = vmatpush3.bf16.msra.mxu1 %v3324_v13  ;;  %v3359_v13 = vld [vmem:[%s266_s10] sm:$0xff]  }
  0xb6   : > { %2335 = vmatmul.mubr.bf16.vlgmr.msra.gmra.mxu0 %v780_v11  ;;  %3071 = vmatprep.subr.bf16.mxu1 %v3326_v15  ;;  %v3439_v11 = vmov 0.0  }
  0xb7   : > { %3050 = vmatpush3.bf16.msra.mxu0 %v3327_v16  ;;  %2414 = vmatprep.mubr.bf16.mxu0 %v801_v14 }
  0xb8   : > { %2375 = vmatmul.mubr.bf16.vlgmr.msra.gmra.mxu1 %v802_v17  ;;  %3051 = vmatprep.subr.bf16.mxu0 %v3329_v18 }
  0xb9   : > { %3072 = vmatpush3.bf16.msra.mxu1 %v3328_v19  ;;  %2454 = vmatprep.mubr.bf16.mxu1 %v805_v20 }
  0xba   : > { %3073 = vmatprep.subr.bf16.mxu1 %v3330_v21 }
  0xbb   : > { %3052 = vmatpush3.bf16.msra.mxu0 %v3331_v22 }
  0xbc   : > { %3053 = vmatprep.subr.bf16.mxu0 %v3333_v23 }
  0xbd   : > { %3074 = vmatpush3.bf16.msra.mxu1 %v3332_v24 }
  0xbe   : > { %3075 = vmatprep.subr.bf16.mxu1 %v3334_v25 }
  0xbf   : > { %3054 = vmatpush3.bf16.msra.mxu0 %v3335_v26 }
  0xc0   : > { %3055 = vmatprep.subr.bf16.mxu0 %v3337_v27 }
  0xc1   : > { %3076 = vmatpush3.bf16.msra.mxu1 %v3336_v28 }
  0xc2   : > { %3077 = vmatprep.subr.bf16.mxu1 %v3338_v29 }
  0xc3   : > { %3056 = vmatpush3.bf16.msra.mxu0 %v3339_v30 }
  0xc4   : > { %3057 = vmatprep.subr.bf16.mxu0 %v3341_v31 }
  0xc5   : > { %3078 = vmatpush3.bf16.msra.mxu1 %v3340_v32 }
  0xc6   : > { %3079 = vmatprep.subr.bf16.mxu1 %v3342_v33 }
  0xc7   : > { %3058 = vmatpush3.bf16.msra.mxu0 %v3343_v34 }
  0xc8   : > { %3059 = vmatprep.subr.bf16.mxu0 %v3345_v35 }
  0xc9   : > { %3080 = vmatpush3.bf16.msra.mxu1 %v3344_v36 }
  0xca   : > { %3081 = vmatprep.subr.bf16.mxu1 %v3346_v37 }
  0xcb   : > { %3060 = vmatpush3.bf16.msra.mxu0 %v3347_v38 }
  0xcc   : > { %3061 = vmatprep.subr.bf16.mxu0 %v3349_v39 }
  0xcd   : > { %3082 = vmatpush3.bf16.msra.mxu1 %v3348_v40 }
  0xce   : > { %3083 = vmatprep.subr.bf16.mxu1 %v3350_v42 }
  0xcf   : > { %3062 = vmatpush3.bf16.msra.mxu0 %v3351_v43 }
  0xd0   : > { %3063 = vmatprep.subr.bf16.mxu0 %v3353_v44 }
  0xd1   : > { %3084 = vmatpush3.bf16.msra.mxu1 %v3352_v45 }
  0xd2   : > { %3085 = vmatprep.subr.bf16.mxu1 %v3354_v46 }
  0xd3   : > { %3064 = vmatpush3.bf16.msra.mxu0 %v3355_v47 }
  0xd4   : > { %3096 = vmatprep.subr.bf16.mxu0 %v3439_v11 }
  0xd5   : > { %3086 = vmatpush3.bf16.msra.mxu1 %v3356_v49 }
  0xd6   : > { %2415 = vmatmul.mubr.bf16.vlgmr.msra.gmra.mxu0 %v787_v48 }
  0xd7   : > { %3097 = vmatpush3.bf16.msra.mxu0 %v3358_v9  ;;  %3100 = vmatprep.mubr.msk.bf16.mxu0 %vm3440_vm0, %v3439_v11 }
  0xd8   : > { %2455 = vmatmul.mubr.bf16.vlgmr.msra.gmra.mxu1 %v803_v50  ;;  %3098 = vmatprep.subr.bf16.mxu0 %v3439_v11 }
  0xdb   : > { %3099 = vmatpush3.bf16.msra.mxu0 %v3359_v13 }
  0xf6   : > { %v2845_v51 = vpop.f32.mrf.mxu0 }
  0xf7   : > { %v2867_v52 = vpop.f32.mrf.mxu1 }
  0xf8   : > { %v2846_v54 = vpop.f32.mrf.mxu0 }
  0xf9   : > { %v2847_v41 = vadd.f32 %v2846_v54, %v2845_v51  ;;  %v2868_v55 = vpop.f32.mrf.mxu1 }
  0xfa   : > { %v2848_v56 = vpop.f32.mrf.mxu0  ;;  %v2869_v58 = vadd.f32 %v2868_v55, %v2867_v52 }
  0xfb   : > { %v2017_v57 = vadd.f32 %v2847_v41, %v655_v53  ;;  %v2870_v59 = vpop.f32.mrf.mxu1 }
  0xfc   : > { %v2849_v60 = vpop.f32.mrf.mxu0 }
  0xfd   : > { %v2057_v61 = vadd.f32 %v2869_v58, %v2017_v57  ;;  %v2871_v62 = vpop.f32.mrf.mxu1 }
 0x116   : > { %v2889_v63 = vpop.f32.mrf.mxu0 }
 0x117   : > { %v2911_v0 = vpop.f32.mrf.mxu1 }
 0x118   : > { %v2890_v1 = vpop.f32.mrf.mxu0 }
 0x119   : > { %v2891_v2 = vadd.f32 %v2890_v1, %v2889_v63  ;;  %v2912_v3 = vpop.f32.mrf.mxu1 }
 0x11a   : > { %v2892_v4 = vpop.f32.mrf.mxu0  ;;  %v2913_v6 = vadd.f32 %v2912_v3, %v2911_v0  ;;  %v2468_v0 = vld [vmem:[%s4216_s4] sm:$0x1] }
 0x11b   : > { %v2097_v5 = vadd.f32 %v2891_v2, %v2057_v61  ;;  %v2914_v7 = vpop.f32.mrf.mxu1 }
 0x11c   : > { %v2893_v8 = vpop.f32.mrf.mxu0 }
 0x11d   : > { %v2137_v10 = vadd.f32 %v2913_v6, %v2097_v5  ;;  %v2915_v12 = vpop.f32.mrf.mxu1 }
 0x136   : > { %v2933_v14 = vpop.f32.mrf.mxu0 }
 0x138   : > { %v2955_v15 = vpop.f32.mrf.mxu1  ;;  %v2934_v16 = vpop.f32.mrf.mxu0 }
 0x139   : > { %v2935_v17 = vadd.f32 %v2934_v16, %v2933_v14 }
 0x13a   : > { %v2956_v18 = vpop.f32.mrf.mxu1  ;;  %v2936_v19 = vpop.f32.mrf.mxu0 }
 0x13b   : > { %v2177_v20 = vadd.f32 %v2935_v17, %v2137_v10  ;;  %v2957_v21 = vadd.f32 %v2956_v18, %v2955_v15 }
 0x13c   : > { %v2958_v22 = vpop.f32.mrf.mxu1  ;;  %v2937_v23 = vpop.f32.mrf.mxu0 }
 0x13d   : > { %v2217_v24 = vadd.f32 %v2957_v21, %v2177_v20 }
 0x13e   : > { %v2959_v25 = vpop.f32.mrf.mxu1 }
 0x156   : > { %v2977_v26 = vpop.f32.mrf.mxu0 }
 0x158   : > { %v2999_v27 = vpop.f32.mrf.mxu1  ;;  %v2978_v28 = vpop.f32.mrf.mxu0 }
 0x159   : > { %v2979_v43 = vadd.f32 %v2978_v28, %v2977_v26 }
 0x15a   : > { %v3000_v29 = vpop.f32.mrf.mxu1  ;;  %v2980_v30 = vpop.f32.mrf.mxu0 }
 0x15b   : > { %v2257_v44 = vadd.f32 %v2979_v43, %v2217_v24  ;;  %v3001_v45 = vadd.f32 %v3000_v29, %v2999_v27 }
 0x15c   : > { %v3002_v31 = vpop.f32.mrf.mxu1  ;;  %v2981_v32 = vpop.f32.mrf.mxu0 }
 0x15d   : > { %v2297_v47 = vadd.f32 %v3001_v45, %v2257_v44 }
 0x15e   : > { %v3003_v33 = vpop.f32.mrf.mxu1 }
 0x176   : > { %v3021_v34 = vpop.f32.mrf.mxu0 }
 0x178   : > { %v3043_v35 = vpop.f32.mrf.mxu1  ;;  %v3022_v36 = vpop.f32.mrf.mxu0 }
 0x179   : > { %v3023_v46 = vadd.f32 %v3022_v36, %v3021_v34 }
 0x17a   : > { %v3044_v37 = vpop.f32.mrf.mxu1  ;;  %v3024_v38 = vpop.f32.mrf.mxu0 }
 0x17b   : > { %v2337_v48 = vadd.f32 %v3023_v46, %v2297_v47  ;;  %v3045_v49 = vadd.f32 %v3044_v37, %v3043_v35 }
 0x17c   : > { %v3046_v39 = vpop.f32.mrf.mxu1  ;;  %v3025_v40 = vpop.f32.mrf.mxu0 }
 0x17d   : > { %v2377_v53 = vadd.f32 %v3045_v49, %v2337_v48 }
 0x17e   : > { %v3047_v42 = vpop.f32.mrf.mxu1 }
 0x196   : > { %v3065_v50 = vpop.f32.mrf.mxu0 }
 0x198   : > { %v3087_v51 = vpop.f32.mrf.mxu1  ;;  %v3066_v52 = vpop.f32.mrf.mxu0 }
 0x199   : > { %v3067_v54 = vadd.f32 %v3066_v52, %v3065_v50 }
 0x19a   : > { %v3088_v41 = vpop.f32.mrf.mxu1  ;;  %v3068_v55 = vpop.f32.mrf.mxu0 }
 0x19b   : > { %v2417_v56 = vadd.f32 %v3067_v54, %v2377_v53  ;;  %v3089_v57 = vadd.f32 %v3088_v41, %v3087_v51 }
 0x19c   : > { %v3090_v58 = vpop.f32.mrf.mxu1  ;;  %v3069_v59 = vpop.f32.mrf.mxu0 }
 0x19d   : > { %v2457_v60 = vadd.f32 %v3089_v57, %v2417_v56 }
 0x19e   : > { %v3091_v61 = vpop.f32.mrf.mxu1 }
 0x19f   : > { %v2462_v62 = vmax.f32 %v2457_v60, 0.0 }
 0x1a1   : > { %v2463_v63 = vpack.c.bf16 %v2462_v62, %v2462_v62 }
 0x1a3   : > { %3101 = vmatmul.mubr.msk.bf16.vlgmr.msra.gmra.mxu0 %vm2481_vm1, %v2463_v63 }
 0x263   : > { %v2519_v1 = vpop.f32.mrf.mxu0 }
 0x264   : > { %v2520_v2 = vadd.f32 %v2519_v1, %v2468_v0 }
 0x265   : > { %v3102_v3 = vpop.f32.mrf.mxu0 }
 0x266   : > { %2526 = vst.msk [vmem:[%s253_s16] sm:$0x1] %vm2525_vm2, %v2520_v2 }
 0x267   : > { %v2522_v4 = vpop.f32.mrf.mxu0 }
 0x268   : > { %3373 = shalt.err (!%p3370_p5)
}
 0x269   : > { %s3374_s9 = scalar_lea.hbm %s4166_s25, 16  ;;  %s3378_s11 = scalar_lea.hbm %s4217_s5, 32 }
 0x26a   : > { %p3375_p6 = scmp.ne.s32.totalorder %s4166_s25, %s3374_s9  ;;  %p3379_p10 = scmp.lt.s32.totalorder %s4166_s25, %s4217_s5 }
 0x26b   : > { %p3380_p11 = scmp.lt.s32.totalorder %s3378_s11, %s3374_s9 }
 0x26c   : > { %p3376_p7 = pnand %p3375_p6, %p3512_p4 }
 0x26d   : > { %p3381_p12 = por %p3380_p11, %p3379_p10 }
 0x26e   : > { %p3377_p9 = pneg %p3376_p7 }
 0x270   : > { %p3382_p13 = pnand %p3381_p12, %p3377_p9 }
 0x272   : > { %3385 = shalt.err (!%p3382_p13)
}
 0x273   : > { %3105 = dma.vmem_to_hbm [thread:$0]  (%p3512_p4), %s4168_s12, 16, %s4166_s25, %s2528_s15   ;;  %v3103_v5 = vpop.f32.mrf.mxu0 }
 0x274 PF: > { %p3111_p0 = scmp.ge.s32.totalorder %s3436_s23, 2  ;;  %s2553_s16 = sand.u32 1, %s3416_s18  }
 0x275   : > { %s2554_s17 = scalar_lea.sflag [#allocation3], %s2553_s16 }
 0x276   : > { %p3108_p1 = pnand %p3111_p0, %p3519_p8 }
 0x278   : > { %p3109_p2 = pneg %p3108_p1 }
 0x27a   : > { %3411 = dma.done.wait (%p3109_p2), %s2554_s17, 16  }
 0x27b   : > { %3413 = vsyncadd (%p3109_p2), %s2554_s17, 4294967280  ;;  %s18_s23 = sadd.s32 1, %s3436_s23   ;;  %s4220_s18 = smov %s3420_s19 }
 0x27c   : > { %p15_p3 = scmp.ge.s32.totalorder %s18_s23, 4   ;;  %s4221_s19 = smov %s3424_s20 }
 0x27d   : > { %s4222_s20 = smov %s3525_s6  ;;  %s4223_s21 = smov %s3432_s22 }
 0x27e   : > { %s4224_s22 = smov %s4226_s26  ;;  %17 = sbr.rel (!%p15_p3) target bundleno = 4 (0x4), region = 78 }
 0x283   :  { %2558 = vsyncpa [#allocation3], 1 }
 0x284   :  { %2560 = vsyncpa [#allocation3 + $0x1], 1 }

</bundles_post_ra>
